<compile_context>
chip_gen: v6e
topology: v6e:2x2x1
jax: 0.10.0
libtpu: 0.0.40
codegen_flags: <defaults>
</compile_context>

<pallas_src>
import jax
import jax.numpy as jnp
from jax.experimental import pallas as pl
from jax.experimental.pallas import tpu as pltpu

# ----------------------------- problem sizes --------------------------------
N = 16       # nodes per graph
IN = 32      # input feature dim
OUT = 16     # per-head output dim
H = 4        # attention heads
M = 2        # number of metapaths
D = H * OUT  # flattened per-metapath embedding dim (= 64)
HS = 128     # SemanticAttention hidden size (default 128)
B = 4        # graphs per batch (grid axis)

NEG_SLOPE = 0.2
NEG_INF = -1e30
_PREC = jax.lax.Precision.DEFAULT


# --------------------------- fused HANLayer kernel ---------------------------
def _han_kernel(adj_bias_ref, adj_mask_ref, h_ref, wcat_ref, headsel_ref,
                bias_ref, w1_ref, b1_ref, w2_ref, out_ref):
    hx = h_ref[...]                                                    # (N, IN)

    # (1) fc projection + attention-logit projection fused into ONE matmul:
    #     (16,32)@(32, M*D+M*2H) = (16,144). Exact: both are linear in h.
    ze = jnp.dot(hx, wcat_ref[...], preferred_element_type=jnp.float32,
                 precision=_PREC)                                      # (N, M*D+M*2H)
    z_all = ze[:, :M * D]                                              # (N, M*D)
    # one small (16,16) transpose gives all metapaths'/heads' logits head-major
    elr_t = ze[:, M * D:].T                                            # (M*2H, N)

    head_sel = headsel_ref[...]                                        # (H*N, D) 0/1
    bias_all = bias_ref[...]                                           # (M, D)

    embs = []
    scores = []
    for m in range(M):                                                 # static unroll
        z = z_all[:, m * D:(m + 1) * D]                                # (N, D)
        el_t = elr_t[m * 2 * H:m * 2 * H + H, :]                       # (H, N) src
        er_t = elr_t[m * 2 * H + H:(m + 1) * 2 * H, :]                 # (H, N) dst

        # (2) stacked edge scores via ONE broadcast add:
        #     e[h*N + dst, src] = er[dst, h] + el[src, h]
        e = (er_t[:, :, None] + el_t[:, None, :]).reshape(H * N, N)    # (H*N, N)
        e = jnp.where(e >= 0.0, e, NEG_SLOPE * e)                      # LeakyReLU(0.2)

        # (3) masked edge softmax via precomputed additive bias + mult. mask.
        e = e + adj_bias_ref[m]                                        # (H*N, N)
        e_max = jnp.max(e, axis=1, keepdims=True)                      # (H*N, 1)
        p = jnp.exp(e - e_max) * adj_mask_ref[m]                       # explicit re-mask
        s = jnp.sum(p, axis=1, keepdims=True)
        # EUP reciprocal; zero-in-degree rows have p == 0 so alpha stays zero.
        alpha = p * pl.reciprocal(jnp.maximum(s, 1e-20), approx=True)  # (H*N, N)

        # (4) all-head aggregation as ONE matmul; head-block selection with a
        #     precomputed f32 mask, then fold the H row-blocks back to (N, D).
        agg = jnp.dot(alpha, z, preferred_element_type=jnp.float32,
                      precision=_PREC)                                 # (H*N, D)
        agg = agg * head_sel
        rst = agg[0:N, :]
        for hh in range(1, H):
            rst = rst + agg[hh * N:(hh + 1) * N, :]                    # (N, D)

        rst = rst + bias_all[m:m + 1, :]                               # + (1, D) bias
        rst = jnp.where(rst > 0.0, rst,
                        jnp.exp(jnp.minimum(rst, 0.0)) - 1.0)          # ELU
        embs.append(rst)

        # Semantic-attention score: Linear(HS) -> tanh -> <., w2>, mean over nodes.
        hid = jnp.tanh(jnp.dot(rst, w1_ref[...], preferred_element_type=jnp.float32,
                               precision=_PREC) + b1_ref[...])         # (N, HS)
        sc = jnp.sum(hid * w2_ref[...], axis=-1, keepdims=True)        # (N, 1)
        scores.append(jnp.sum(sc, axis=0, keepdims=True) * (1.0 / N))  # (1, 1)

    # Softmax over the M metapath scores and weighted sum of embeddings.
    w_max = scores[0]
    for m in range(1, M):
        w_max = jnp.maximum(w_max, scores[m])
    exps = [jnp.exp(sc - w_max) for sc in scores]
    denom = exps[0]
    for m in range(1, M):
        denom = denom + exps[m]
    inv = 1.0 / denom                                                  # (1, 1)
    out = embs[0] * (exps[0] * inv)
    for m in range(1, M):
        out = out + embs[m] * (exps[m] * inv)
    out_ref[...] = out


# ------------------------------ HANLayer forward ------------------------------
@jax.jit
def han_layer(adj, h, params):
    """adj: (B, M, N, N) dense 0/1 float, h: (B, N, IN)."""
    bsz = h.shape[0]

    # ---- wrapper-side layout plumbing (XLA-fused, kept out of the kernel) ----
    fc_w = params["fc_w"]                                              # (M, D, IN)
    w_all = jnp.transpose(fc_w, (2, 0, 1)).reshape(IN, M * D)          # (IN, M*D)

    eye_h = jnp.eye(H, dtype=jnp.float32)
    al_bd = (params["attn_l"][:, :, :, None] * eye_h[None, :, None, :]).reshape(M, D, H)
    ar_bd = (params["attn_r"][:, :, :, None] * eye_h[None, :, None, :]).reshape(M, D, H)
    alr_bd = jnp.concatenate([al_bd, ar_bd], axis=-1)                  # (M, D, 2H)
    alr_all = jnp.zeros((M * D, M * 2 * H), jnp.float32)               # block-diag
    for m in range(M):
        alr_all = alr_all.at[m * D:(m + 1) * D,
                             m * 2 * H:(m + 1) * 2 * H].set(alr_bd[m])
    # Fold the logit projection into the fc weight (exact composition, f32).
    w_elr = jnp.dot(w_all, alr_all, precision=jax.lax.Precision.HIGHEST)
    w_cat = jnp.concatenate([w_all, w_elr], axis=1)                    # (IN, M*D+M*2H)

    # Masked-softmax plumbing, pre-tiled over heads.
    adj_bias = jnp.tile(jnp.where(adj > 0, 0.0, NEG_INF).astype(jnp.float32),
                        (1, 1, H, 1))                                  # (B, M, H*N, N)
    adj_mask = jnp.tile((adj > 0).astype(jnp.float32), (1, 1, H, 1))   # (B, M, H*N, N)

    head_sel = (jnp.arange(H * N)[:, None] // N ==
                jnp.arange(D)[None, :] // OUT).astype(jnp.float32)     # (H*N, D)

    gat_bias = params["gat_bias"].reshape(M, D)
    w1_t = params["sem_w1"].T                                          # (D, HS)

    # Weight operands use constant index_maps -> DMA'd once, VMEM-resident.
    def kept(shape):
        return pl.BlockSpec(shape, lambda b: (0,) * len(shape))

    return pl.pallas_call(
        _han_kernel,
        out_shape=jax.ShapeDtypeStruct((bsz, N, D), jnp.float32),
        grid=(bsz,),
        in_specs=[
            pl.BlockSpec((None, M, H * N, N), lambda b: (b, 0, 0, 0)),  # adj_bias
            pl.BlockSpec((None, M, H * N, N), lambda b: (b, 0, 0, 0)),  # adj_mask
            pl.BlockSpec((None, N, IN), lambda b: (b, 0, 0)),           # h
            kept((IN, M * D + M * 2 * H)),                              # fused fc+attn W
            kept((H * N, D)),                                           # head_sel mask
            kept((M, D)),                                               # GAT bias
            kept((D, HS)),                                              # sem W1^T
            kept((1, HS)),                                              # sem b1
            kept((1, HS)),                                              # sem w2
        ],
        out_specs=pl.BlockSpec((None, N, D), lambda b: (b, 0, 0)),
        compiler_params=pltpu.CompilerParams(
            dimension_semantics=("parallel",)),                         # v7x megacore
    )(adj_bias, adj_mask, h, w_cat, head_sel, gat_bias, w1_t,
      params["sem_b1"], params["sem_w2"])


# ----------------------------- pure-JAX reference -----------------------------
def han_layer_ref(adj, h, params):
    def one(adj_g, h_g):
        embs = []
        for m in range(M):
            z = h_g @ params["fc_w"][m].T                              # (N, D)
            z3 = z.reshape(N, H, OUT)
            el = jnp.sum(z3 * params["attn_l"][m][None], axis=-1)      # (N, H) src
            er = jnp.sum(z3 * params["attn_r"][m][None], axis=-1)      # (N, H) dst
            e = er[:, None, :] + el[None, :, :]                        # (dst, src, H)
            e = jnp.where(e >= 0, e, NEG_SLOPE * e)
            A = adj_g[m]
            e_m = jnp.where(A[:, :, None] > 0, e, NEG_INF)
            e_max = jnp.max(e_m, axis=1, keepdims=True)
            p = jnp.exp(e_m - e_max) * A[:, :, None]
            s = jnp.sum(p, axis=1, keepdims=True)
            alpha = p / jnp.maximum(s, 1e-20)
            rst = jnp.einsum("ijh,jhd->ihd", alpha, z3).reshape(N, D)
            rst = rst + params["gat_bias"][m][0]
            rst = jnp.where(rst > 0, rst, jnp.exp(jnp.minimum(rst, 0.0)) - 1.0)
            embs.append(rst)
        zz = jnp.stack(embs, axis=1)                                   # (N, M, D)
        proj = (jnp.tanh(zz @ params["sem_w1"].T + params["sem_b1"][0])
                @ params["sem_w2"].T)
        w = proj.mean(0)                                               # (M, 1)
        beta = jax.nn.softmax(w, axis=0)
        return (beta[None] * zz).sum(1)                                # (N, D)
    return jnp.stack([one(adj[b], h[b]) for b in range(adj.shape[0])], axis=0)


# ----------------------------------- main -------------------------------------
if __name__ == "__main__":
    key = jax.random.PRNGKey(0)
    keys = jax.random.split(key, 10)

    h = jax.random.normal(keys[0], (B, N, IN), dtype=jnp.float32)
    adj = (jax.random.uniform(keys[1], (B, M, N, N)) < 0.3).astype(jnp.float32)

    params = {
        "fc_w":   0.1 * jax.random.normal(keys[2], (M, D, IN), dtype=jnp.float32),
        "attn_l": 0.1 * jax.random.normal(keys[3], (M, H, OUT), dtype=jnp.float32),
        "attn_r": 0.1 * jax.random.normal(keys[4], (M, H, OUT), dtype=jnp.float32),
        "gat_bias": 0.1 * jax.random.normal(keys[5], (M, 1, D), dtype=jnp.float32),
        "sem_w1": 0.1 * jax.random.normal(keys[6], (HS, D), dtype=jnp.float32),
        "sem_b1": 0.1 * jax.random.normal(keys[7], (1, HS), dtype=jnp.float32),
        "sem_w2": 0.1 * jax.random.normal(keys[8], (1, HS), dtype=jnp.float32),
    }

    out = jax.block_until_ready(han_layer(adj, h, params))
    ref = jax.block_until_ready(han_layer_ref(adj, h, params))

    assert out.shape == (B, N, D)
    # Tolerance covers single-pass bf16 MXU (default precision, pinned) and the
    # approximate EUP reciprocal in the edge softmax; structural bugs produce
    # errors orders of magnitude larger.
    assert jnp.allclose(out, ref, atol=5e-3, rtol=5e-3), \
        f"max abs diff {jnp.max(jnp.abs(out - ref))}"
    print("KERNEL_OK")
</pallas_src>

<mosaic_0001>
module attributes {stable_mosaic.version = 11 : i64} {
  func.func @_han_kernel(%arg0: i32, %arg1: memref<1x2x64x16xf32, #tpu.memory_space<vmem>>, %arg2: memref<1x2x64x16xf32, #tpu.memory_space<vmem>>, %arg3: memref<1x16x32xf32, #tpu.memory_space<vmem>>, %arg4: memref<32x144xf32, #tpu.memory_space<vmem>>, %arg5: memref<64x64xf32, #tpu.memory_space<vmem>>, %arg6: memref<2x64xf32, #tpu.memory_space<vmem>>, %arg7: memref<64x128xf32, #tpu.memory_space<vmem>>, %arg8: memref<1x128xf32, #tpu.memory_space<vmem>>, %arg9: memref<1x128xf32, #tpu.memory_space<vmem>>, %arg10: memref<1x16x64xf32, #tpu.memory_space<vmem>>) attributes {dimension_semantics = [#tpu.dimension_semantics<parallel>], iteration_bounds = array<i64: 4>, scalar_prefetch = 0 : i64, scratch_operands = 0 : i64, tpu.core_type = #tpu.core_type<tc>, window_params = [{transform_indices = @transform_0, window_bounds = array<i64: 1, 2, 64, 16>}, {transform_indices = @transform_1, window_bounds = array<i64: 1, 2, 64, 16>}, {transform_indices = @transform_2, window_bounds = array<i64: 1, 16, 32>}, {pipeline_mode = #tpu.pipeline_mode<synchronous>, transform_indices = @transform_3, window_bounds = array<i64: 32, 144>}, {pipeline_mode = #tpu.pipeline_mode<synchronous>, transform_indices = @transform_4, window_bounds = array<i64: 64, 64>}, {pipeline_mode = #tpu.pipeline_mode<synchronous>, transform_indices = @transform_5, window_bounds = array<i64: 2, 64>}, {pipeline_mode = #tpu.pipeline_mode<synchronous>, transform_indices = @transform_6, window_bounds = array<i64: 64, 128>}, {pipeline_mode = #tpu.pipeline_mode<synchronous>, transform_indices = @transform_7, window_bounds = array<i64: 1, 128>}, {pipeline_mode = #tpu.pipeline_mode<synchronous>, transform_indices = @transform_8, window_bounds = array<i64: 1, 128>}, {transform_indices = @transform_9, window_bounds = array<i64: 1, 16, 64>}]} {
    %c0 = arith.constant 0 : index
    %c0_0 = arith.constant 0 : index
    %c0_1 = arith.constant 0 : index
    %0 = vector.load %arg3[%c0, %c0_0, %c0_1] : memref<1x16x32xf32, #tpu.memory_space<vmem>>, vector<1x16x32xf32>
    %1 = vector.shape_cast %0 : vector<1x16x32xf32> to vector<16x32xf32>
    %c0_2 = arith.constant 0 : index
    %c0_3 = arith.constant 0 : index
    %2 = vector.load %arg4[%c0_2, %c0_3] : memref<32x144xf32, #tpu.memory_space<vmem>>, vector<32x144xf32>
    %cst = arith.constant dense<0.000000e+00> : vector<16x144xf32>
    %3 = tpu.matmul %1, %2, %cst {dimension_numbers = #tpu.dot_dimension_numbers<[1], [0], [0], [1], [0, 0, 1, 1], [], []>} : vector<16x32xf32>, vector<32x144xf32>, vector<16x144xf32> -> vector<16x144xf32>
    %4 = vector.extract_strided_slice %3 {offsets = [0, 0], sizes = [16, 128], strides = [1, 1]} : vector<16x144xf32> to vector<16x128xf32>
    %5 = vector.extract_strided_slice %3 {offsets = [0, 128], sizes = [16, 16], strides = [1, 1]} : vector<16x144xf32> to vector<16x16xf32>
    %6 = tpu.transpose %5, [1, 0] : vector<16x16xf32> -> vector<16x16xf32>
    %c0_4 = arith.constant 0 : index
    %c0_5 = arith.constant 0 : index
    %7 = vector.load %arg5[%c0_4, %c0_5] : memref<64x64xf32, #tpu.memory_space<vmem>>, vector<64x64xf32>
    %c0_6 = arith.constant 0 : index
    %c0_7 = arith.constant 0 : index
    %8 = vector.load %arg6[%c0_6, %c0_7] : memref<2x64xf32, #tpu.memory_space<vmem>>, vector<2x64xf32>
    %9 = vector.extract_strided_slice %4 {offsets = [0, 0], sizes = [16, 64], strides = [1, 1]} : vector<16x128xf32> to vector<16x64xf32>
    %10 = vector.extract_strided_slice %6 {offsets = [0, 0], sizes = [4, 16], strides = [1, 1]} : vector<16x16xf32> to vector<4x16xf32>
    %11 = vector.extract_strided_slice %6 {offsets = [4, 0], sizes = [4, 16], strides = [1, 1]} : vector<16x16xf32> to vector<4x16xf32>
    %12 = vector.shape_cast %11 : vector<4x16xf32> to vector<4x16x1xf32>
    %13 = vector.shape_cast %10 : vector<4x16xf32> to vector<4x1x16xf32>
    %14 = vector.broadcast %12 : vector<4x16x1xf32> to vector<4x16x16xf32>
    %15 = vector.broadcast %13 : vector<4x1x16xf32> to vector<4x16x16xf32>
    %16 = arith.addf %14, %15 : vector<4x16x16xf32>
    %17 = vector.shape_cast %16 : vector<4x16x16xf32> to vector<64x16xf32>
    %cst_8 = arith.constant 0.000000e+00 : f32
    %18 = vector.broadcast %cst_8 : f32 to vector<64x16xf32>
    %19 = arith.cmpf oge, %17, %18 : vector<64x16xf32>
    %cst_9 = arith.constant 2.000000e-01 : f32
    %20 = vector.broadcast %cst_9 : f32 to vector<64x16xf32>
    %21 = arith.mulf %20, %17 : vector<64x16xf32>
    %22 = arith.select %19, %17, %21 : vector<64x16xi1>, vector<64x16xf32>
    %c0_10 = arith.constant 0 : index
    %c0_11 = arith.constant 0 : index
    %c0_12 = arith.constant 0 : index
    %c0_13 = arith.constant 0 : index
    %23 = vector.load %arg1[%c0_10, %c0_11, %c0_12, %c0_13] : memref<1x2x64x16xf32, #tpu.memory_space<vmem>>, vector<1x1x64x16xf32>
    %24 = vector.shape_cast %23 : vector<1x1x64x16xf32> to vector<64x16xf32>
    %25 = arith.addf %22, %24 : vector<64x16xf32>
    %cst_14 = arith.constant dense<0xFF800000> : vector<64xf32>
    %26 = vector.multi_reduction <maximumf>, %25, %cst_14 [1] : vector<64x16xf32> to vector<64xf32>
    %27 = vector.shape_cast %26 : vector<64xf32> to vector<64x1xf32>
    %28 = vector.broadcast %27 : vector<64x1xf32> to vector<64x16xf32>
    %29 = arith.subf %25, %28 : vector<64x16xf32>
    %30 = math.exp %29 : vector<64x16xf32>
    %c0_15 = arith.constant 0 : index
    %c0_16 = arith.constant 0 : index
    %c0_17 = arith.constant 0 : index
    %c0_18 = arith.constant 0 : index
    %31 = vector.load %arg2[%c0_15, %c0_16, %c0_17, %c0_18] : memref<1x2x64x16xf32, #tpu.memory_space<vmem>>, vector<1x1x64x16xf32>
    %32 = vector.shape_cast %31 : vector<1x1x64x16xf32> to vector<64x16xf32>
    %33 = arith.mulf %30, %32 : vector<64x16xf32>
    %cst_19 = arith.constant dense<0.000000e+00> : vector<64xf32>
    %34 = vector.multi_reduction <add>, %33, %cst_19 [1] : vector<64x16xf32> to vector<64xf32>
    %35 = vector.shape_cast %34 : vector<64xf32> to vector<64x1xf32>
    %cst_20 = arith.constant 9.99999968E-21 : f32
    %36 = vector.broadcast %cst_20 : f32 to vector<64x1xf32>
    %37 = arith.maximumf %35, %36 : vector<64x1xf32>
    %38 = tpu.reciprocal %37 {approx = true} : vector<64x1xf32> -> vector<64x1xf32>
    %39 = vector.broadcast %38 : vector<64x1xf32> to vector<64x16xf32>
    %40 = arith.mulf %33, %39 : vector<64x16xf32>
    %cst_21 = arith.constant dense<0.000000e+00> : vector<64x64xf32>
    %41 = tpu.matmul %40, %9, %cst_21 {dimension_numbers = #tpu.dot_dimension_numbers<[1], [0], [0], [1], [0, 0, 1, 1], [], []>} : vector<64x16xf32>, vector<16x64xf32>, vector<64x64xf32> -> vector<64x64xf32>
    %42 = arith.mulf %41, %7 : vector<64x64xf32>
    %43 = vector.extract_strided_slice %42 {offsets = [0, 0], sizes = [16, 64], strides = [1, 1]} : vector<64x64xf32> to vector<16x64xf32>
    %44 = vector.extract_strided_slice %42 {offsets = [16, 0], sizes = [16, 64], strides = [1, 1]} : vector<64x64xf32> to vector<16x64xf32>
    %45 = arith.addf %43, %44 : vector<16x64xf32>
    %46 = vector.extract_strided_slice %42 {offsets = [32, 0], sizes = [16, 64], strides = [1, 1]} : vector<64x64xf32> to vector<16x64xf32>
    %47 = arith.addf %45, %46 : vector<16x64xf32>
    %48 = vector.extract_strided_slice %42 {offsets = [48, 0], sizes = [16, 64], strides = [1, 1]} : vector<64x64xf32> to vector<16x64xf32>
    %49 = arith.addf %47, %48 : vector<16x64xf32>
    %50 = vector.extract_strided_slice %8 {offsets = [0, 0], sizes = [1, 64], strides = [1, 1]} : vector<2x64xf32> to vector<1x64xf32>
    %51 = vector.broadcast %50 : vector<1x64xf32> to vector<16x64xf32>
    %52 = arith.addf %49, %51 : vector<16x64xf32>
    %cst_22 = arith.constant 0.000000e+00 : f32
    %53 = vector.broadcast %cst_22 : f32 to vector<16x64xf32>
    %54 = arith.cmpf ogt, %52, %53 : vector<16x64xf32>
    %cst_23 = arith.constant 0.000000e+00 : f32
    %55 = vector.broadcast %cst_23 : f32 to vector<16x64xf32>
    %56 = arith.minimumf %52, %55 : vector<16x64xf32>
    %57 = math.exp %56 : vector<16x64xf32>
    %cst_24 = arith.constant 1.000000e+00 : f32
    %58 = vector.broadcast %cst_24 : f32 to vector<16x64xf32>
    %59 = arith.subf %57, %58 : vector<16x64xf32>
    %60 = arith.select %54, %52, %59 : vector<16x64xi1>, vector<16x64xf32>
    %c0_25 = arith.constant 0 : index
    %c0_26 = arith.constant 0 : index
    %61 = vector.load %arg7[%c0_25, %c0_26] : memref<64x128xf32, #tpu.memory_space<vmem>>, vector<64x128xf32>
    %cst_27 = arith.constant dense<0.000000e+00> : vector<16x128xf32>
    %62 = tpu.matmul %60, %61, %cst_27 {dimension_numbers = #tpu.dot_dimension_numbers<[1], [0], [0], [1], [0, 0, 1, 1], [], []>} : vector<16x64xf32>, vector<64x128xf32>, vector<16x128xf32> -> vector<16x128xf32>
    %c0_28 = arith.constant 0 : index
    %c0_29 = arith.constant 0 : index
    %63 = vector.load %arg8[%c0_28, %c0_29] : memref<1x128xf32, #tpu.memory_space<vmem>>, vector<1x128xf32>
    %64 = vector.broadcast %63 : vector<1x128xf32> to vector<16x128xf32>
    %65 = arith.addf %62, %64 : vector<16x128xf32>
    %66 = math.tanh %65 : vector<16x128xf32>
    %c0_30 = arith.constant 0 : index
    %c0_31 = arith.constant 0 : index
    %67 = vector.load %arg9[%c0_30, %c0_31] : memref<1x128xf32, #tpu.memory_space<vmem>>, vector<1x128xf32>
    %68 = vector.broadcast %67 : vector<1x128xf32> to vector<16x128xf32>
    %69 = arith.mulf %66, %68 : vector<16x128xf32>
    %cst_32 = arith.constant dense<0.000000e+00> : vector<16xf32>
    %70 = vector.multi_reduction <add>, %69, %cst_32 [1] : vector<16x128xf32> to vector<16xf32>
    %71 = vector.shape_cast %70 : vector<16xf32> to vector<16x1xf32>
    %cst_33 = arith.constant dense<0.000000e+00> : vector<1xf32>
    %72 = vector.multi_reduction <add>, %71, %cst_33 [0] : vector<16x1xf32> to vector<1xf32>
    %73 = vector.shape_cast %72 : vector<1xf32> to vector<1x1xf32>
    %cst_34 = arith.constant 6.250000e-02 : f32
    %74 = vector.broadcast %cst_34 : f32 to vector<1x1xf32>
    %75 = arith.mulf %73, %74 : vector<1x1xf32>
    %76 = vector.extract_strided_slice %4 {offsets = [0, 64], sizes = [16, 64], strides = [1, 1]} : vector<16x128xf32> to vector<16x64xf32>
    %77 = vector.extract_strided_slice %6 {offsets = [8, 0], sizes = [4, 16], strides = [1, 1]} : vector<16x16xf32> to vector<4x16xf32>
    %78 = vector.extract_strided_slice %6 {offsets = [12, 0], sizes = [4, 16], strides = [1, 1]} : vector<16x16xf32> to vector<4x16xf32>
    %79 = vector.shape_cast %78 : vector<4x16xf32> to vector<4x16x1xf32>
    %80 = vector.shape_cast %77 : vector<4x16xf32> to vector<4x1x16xf32>
    %81 = vector.broadcast %79 : vector<4x16x1xf32> to vector<4x16x16xf32>
    %82 = vector.broadcast %80 : vector<4x1x16xf32> to vector<4x16x16xf32>
    %83 = arith.addf %81, %82 : vector<4x16x16xf32>
    %84 = vector.shape_cast %83 : vector<4x16x16xf32> to vector<64x16xf32>
    %cst_35 = arith.constant 0.000000e+00 : f32
    %85 = vector.broadcast %cst_35 : f32 to vector<64x16xf32>
    %86 = arith.cmpf oge, %84, %85 : vector<64x16xf32>
    %cst_36 = arith.constant 2.000000e-01 : f32
    %87 = vector.broadcast %cst_36 : f32 to vector<64x16xf32>
    %88 = arith.mulf %87, %84 : vector<64x16xf32>
    %89 = arith.select %86, %84, %88 : vector<64x16xi1>, vector<64x16xf32>
    %c0_37 = arith.constant 0 : index
    %c1 = arith.constant 1 : index
    %c0_38 = arith.constant 0 : index
    %c0_39 = arith.constant 0 : index
    %90 = vector.load %arg1[%c0_37, %c1, %c0_38, %c0_39] : memref<1x2x64x16xf32, #tpu.memory_space<vmem>>, vector<1x1x64x16xf32>
    %91 = vector.shape_cast %90 : vector<1x1x64x16xf32> to vector<64x16xf32>
    %92 = arith.addf %89, %91 : vector<64x16xf32>
    %cst_40 = arith.constant dense<0xFF800000> : vector<64xf32>
    %93 = vector.multi_reduction <maximumf>, %92, %cst_40 [1] : vector<64x16xf32> to vector<64xf32>
    %94 = vector.shape_cast %93 : vector<64xf32> to vector<64x1xf32>
    %95 = vector.broadcast %94 : vector<64x1xf32> to vector<64x16xf32>
    %96 = arith.subf %92, %95 : vector<64x16xf32>
    %97 = math.exp %96 : vector<64x16xf32>
    %c0_41 = arith.constant 0 : index
    %c1_42 = arith.constant 1 : index
    %c0_43 = arith.constant 0 : index
    %c0_44 = arith.constant 0 : index
    %98 = vector.load %arg2[%c0_41, %c1_42, %c0_43, %c0_44] : memref<1x2x64x16xf32, #tpu.memory_space<vmem>>, vector<1x1x64x16xf32>
    %99 = vector.shape_cast %98 : vector<1x1x64x16xf32> to vector<64x16xf32>
    %100 = arith.mulf %97, %99 : vector<64x16xf32>
    %cst_45 = arith.constant dense<0.000000e+00> : vector<64xf32>
    %101 = vector.multi_reduction <add>, %100, %cst_45 [1] : vector<64x16xf32> to vector<64xf32>
    %102 = vector.shape_cast %101 : vector<64xf32> to vector<64x1xf32>
    %cst_46 = arith.constant 9.99999968E-21 : f32
    %103 = vector.broadcast %cst_46 : f32 to vector<64x1xf32>
    %104 = arith.maximumf %102, %103 : vector<64x1xf32>
    %105 = tpu.reciprocal %104 {approx = true} : vector<64x1xf32> -> vector<64x1xf32>
    %106 = vector.broadcast %105 : vector<64x1xf32> to vector<64x16xf32>
    %107 = arith.mulf %100, %106 : vector<64x16xf32>
    %cst_47 = arith.constant dense<0.000000e+00> : vector<64x64xf32>
    %108 = tpu.matmul %107, %76, %cst_47 {dimension_numbers = #tpu.dot_dimension_numbers<[1], [0], [0], [1], [0, 0, 1, 1], [], []>} : vector<64x16xf32>, vector<16x64xf32>, vector<64x64xf32> -> vector<64x64xf32>
    %109 = arith.mulf %108, %7 : vector<64x64xf32>
    %110 = vector.extract_strided_slice %109 {offsets = [0, 0], sizes = [16, 64], strides = [1, 1]} : vector<64x64xf32> to vector<16x64xf32>
    %111 = vector.extract_strided_slice %109 {offsets = [16, 0], sizes = [16, 64], strides = [1, 1]} : vector<64x64xf32> to vector<16x64xf32>
    %112 = arith.addf %110, %111 : vector<16x64xf32>
    %113 = vector.extract_strided_slice %109 {offsets = [32, 0], sizes = [16, 64], strides = [1, 1]} : vector<64x64xf32> to vector<16x64xf32>
    %114 = arith.addf %112, %113 : vector<16x64xf32>
    %115 = vector.extract_strided_slice %109 {offsets = [48, 0], sizes = [16, 64], strides = [1, 1]} : vector<64x64xf32> to vector<16x64xf32>
    %116 = arith.addf %114, %115 : vector<16x64xf32>
    %117 = vector.extract_strided_slice %8 {offsets = [1, 0], sizes = [1, 64], strides = [1, 1]} : vector<2x64xf32> to vector<1x64xf32>
    %118 = vector.broadcast %117 : vector<1x64xf32> to vector<16x64xf32>
    %119 = arith.addf %116, %118 : vector<16x64xf32>
    %cst_48 = arith.constant 0.000000e+00 : f32
    %120 = vector.broadcast %cst_48 : f32 to vector<16x64xf32>
    %121 = arith.cmpf ogt, %119, %120 : vector<16x64xf32>
    %cst_49 = arith.constant 0.000000e+00 : f32
    %122 = vector.broadcast %cst_49 : f32 to vector<16x64xf32>
    %123 = arith.minimumf %119, %122 : vector<16x64xf32>
    %124 = math.exp %123 : vector<16x64xf32>
    %cst_50 = arith.constant 1.000000e+00 : f32
    %125 = vector.broadcast %cst_50 : f32 to vector<16x64xf32>
    %126 = arith.subf %124, %125 : vector<16x64xf32>
    %127 = arith.select %121, %119, %126 : vector<16x64xi1>, vector<16x64xf32>
    %c0_51 = arith.constant 0 : index
    %c0_52 = arith.constant 0 : index
    %128 = vector.load %arg7[%c0_51, %c0_52] : memref<64x128xf32, #tpu.memory_space<vmem>>, vector<64x128xf32>
    %cst_53 = arith.constant dense<0.000000e+00> : vector<16x128xf32>
    %129 = tpu.matmul %127, %128, %cst_53 {dimension_numbers = #tpu.dot_dimension_numbers<[1], [0], [0], [1], [0, 0, 1, 1], [], []>} : vector<16x64xf32>, vector<64x128xf32>, vector<16x128xf32> -> vector<16x128xf32>
    %c0_54 = arith.constant 0 : index
    %c0_55 = arith.constant 0 : index
    %130 = vector.load %arg8[%c0_54, %c0_55] : memref<1x128xf32, #tpu.memory_space<vmem>>, vector<1x128xf32>
    %131 = vector.broadcast %130 : vector<1x128xf32> to vector<16x128xf32>
    %132 = arith.addf %129, %131 : vector<16x128xf32>
    %133 = math.tanh %132 : vector<16x128xf32>
    %c0_56 = arith.constant 0 : index
    %c0_57 = arith.constant 0 : index
    %134 = vector.load %arg9[%c0_56, %c0_57] : memref<1x128xf32, #tpu.memory_space<vmem>>, vector<1x128xf32>
    %135 = vector.broadcast %134 : vector<1x128xf32> to vector<16x128xf32>
    %136 = arith.mulf %133, %135 : vector<16x128xf32>
    %cst_58 = arith.constant dense<0.000000e+00> : vector<16xf32>
    %137 = vector.multi_reduction <add>, %136, %cst_58 [1] : vector<16x128xf32> to vector<16xf32>
    %138 = vector.shape_cast %137 : vector<16xf32> to vector<16x1xf32>
    %cst_59 = arith.constant dense<0.000000e+00> : vector<1xf32>
    %139 = vector.multi_reduction <add>, %138, %cst_59 [0] : vector<16x1xf32> to vector<1xf32>
    %140 = vector.shape_cast %139 : vector<1xf32> to vector<1x1xf32>
    %cst_60 = arith.constant 6.250000e-02 : f32
    %141 = vector.broadcast %cst_60 : f32 to vector<1x1xf32>
    %142 = arith.mulf %140, %141 : vector<1x1xf32>
    %143 = arith.maximumf %75, %142 : vector<1x1xf32>
    %144 = arith.subf %75, %143 : vector<1x1xf32>
    %145 = math.exp %144 : vector<1x1xf32>
    %146 = arith.subf %142, %143 : vector<1x1xf32>
    %147 = math.exp %146 : vector<1x1xf32>
    %148 = arith.addf %145, %147 : vector<1x1xf32>
    %cst_61 = arith.constant 1.000000e+00 : f32
    %149 = vector.broadcast %cst_61 : f32 to vector<1x1xf32>
    %150 = arith.divf %149, %148 : vector<1x1xf32>
    %151 = arith.mulf %145, %150 : vector<1x1xf32>
    %152 = vector.broadcast %151 : vector<1x1xf32> to vector<16x64xf32>
    %153 = arith.mulf %60, %152 : vector<16x64xf32>
    %154 = arith.mulf %147, %150 : vector<1x1xf32>
    %155 = vector.broadcast %154 : vector<1x1xf32> to vector<16x64xf32>
    %156 = arith.mulf %127, %155 : vector<16x64xf32>
    %157 = arith.addf %153, %156 : vector<16x64xf32>
    %c0_62 = arith.constant 0 : index
    %c0_63 = arith.constant 0 : index
    %c0_64 = arith.constant 0 : index
    %158 = vector.load %arg10[%c0_62, %c0_63, %c0_64] : memref<1x16x64xf32, #tpu.memory_space<vmem>>, vector<1x16x64xf32>
    %159 = vector.shape_cast %158 : vector<1x16x64xf32> to vector<16x64xf32>
    %160 = vector.shape_cast %157 : vector<16x64xf32> to vector<1x16x64xf32>
    tpu.vector_store %arg10[%c0_62, %c0_63, %c0_64], %160 {strides = array<i32>} : memref<1x16x64xf32, #tpu.memory_space<vmem>>, vector<1x16x64xf32>,
    return
  }
  func.func @transform_0(%arg0: i32) -> (i32, i32, i32, i32) {
    %c0_i32 = arith.constant 0 : i32
    %c0_i32_0 = arith.constant 0 : i32
    %c0_i32_1 = arith.constant 0 : i32
    %c0_i32_2 = arith.constant 0 : i32
    return %arg0, %c0_i32, %c0_i32_0, %c0_i32_1 : i32, i32, i32, i32
  }
  func.func @transform_1(%arg0: i32) -> (i32, i32, i32, i32) {
    %c0_i32 = arith.constant 0 : i32
    %c0_i32_0 = arith.constant 0 : i32
    %c0_i32_1 = arith.constant 0 : i32
    %c0_i32_2 = arith.constant 0 : i32
    return %arg0, %c0_i32, %c0_i32_0, %c0_i32_1 : i32, i32, i32, i32
  }
  func.func @transform_2(%arg0: i32) -> (i32, i32, i32) {
    %c0_i32 = arith.constant 0 : i32
    %c0_i32_0 = arith.constant 0 : i32
    %c0_i32_1 = arith.constant 0 : i32
    return %arg0, %c0_i32, %c0_i32_0 : i32, i32, i32
  }
  func.func @transform_3(%arg0: i32) -> (i32, i32) {
    %c0_i32 = arith.constant 0 : i32
    %c0_i32_0 = arith.constant 0 : i32
    %c0_i32_1 = arith.constant 0 : i32
    return %c0_i32, %c0_i32_0 : i32, i32
  }
  func.func @transform_4(%arg0: i32) -> (i32, i32) {
    %c0_i32 = arith.constant 0 : i32
    %c0_i32_0 = arith.constant 0 : i32
    %c0_i32_1 = arith.constant 0 : i32
    return %c0_i32, %c0_i32_0 : i32, i32
  }
  func.func @transform_5(%arg0: i32) -> (i32, i32) {
    %c0_i32 = arith.constant 0 : i32
    %c0_i32_0 = arith.constant 0 : i32
    %c0_i32_1 = arith.constant 0 : i32
    return %c0_i32, %c0_i32_0 : i32, i32
  }
  func.func @transform_6(%arg0: i32) -> (i32, i32) {
    %c0_i32 = arith.constant 0 : i32
    %c0_i32_0 = arith.constant 0 : i32
    %c0_i32_1 = arith.constant 0 : i32
    return %c0_i32, %c0_i32_0 : i32, i32
  }
  func.func @transform_7(%arg0: i32) -> (i32, i32) {
    %c0_i32 = arith.constant 0 : i32
    %c0_i32_0 = arith.constant 0 : i32
    %c0_i32_1 = arith.constant 0 : i32
    return %c0_i32, %c0_i32_0 : i32, i32
  }
  func.func @transform_8(%arg0: i32) -> (i32, i32) {
    %c0_i32 = arith.constant 0 : i32
    %c0_i32_0 = arith.constant 0 : i32
    %c0_i32_1 = arith.constant 0 : i32
    return %c0_i32, %c0_i32_0 : i32, i32
  }
  func.func @transform_9(%arg0: i32) -> (i32, i32, i32) {
    %c0_i32 = arith.constant 0 : i32
    %c0_i32_0 = arith.constant 0 : i32
    %c0_i32_1 = arith.constant 0 : i32
    return %arg0, %c0_i32, %c0_i32_0 : i32, i32, i32
  }
}

</mosaic_0001>

<bundles_post_ra>
// kernel: han_layer.1
= control target key start
LH: loop header
LB: loop body
LE: loop exit
PB: predicated region body
PF: predicated region fallthrough
CT: control target
= control target key end

     0   :  { %14 = vsyncpa [#allocation3], 0  ;;  %s2580_s0 = inlined_call_operand.vmem [shape: f32[4,2,64,16], index: 0, kind: input, shape index: {}]   ;;  %s2581_s1 = inlined_call_operand.vmem [shape: f32[4,2,64,16], index: 1, kind: input, shape index: {}]   ;;  %s2582_s2 = inlined_call_operand.vmem [shape: f32[4,16,32], index: 2, kind: input, shape index: {}]   ;;  %s2583_s3 = inlined_call_operand.vmem [shape: f32[32,144], index: 3, kind: input, shape index: {}]   ;;  %s2584_s4 = inlined_call_operand.vmem [shape: f32[64,64], index: 4, kind: input, shape index: {}]   ;;  %s2585_s5 = inlined_call_operand.vmem [shape: f32[2,64], index: 5, kind: input, shape index: {}]   ;;  %s2586_s6 = inlined_call_operand.vmem [shape: f32[64,128], index: 6, kind: input, shape index: {}]   ;;  %s2587_s7 = inlined_call_operand.vmem [shape: f32[1,128], index: 7, kind: input, shape index: {}]   ;;  %s2588_s8 = inlined_call_operand.vmem [shape: f32[1,128], index: 8, kind: input, shape index: {}]   ;;  %s2589_s9 = inlined_call_operand.hbm [shape: f32[4,16,64], index: 9, kind: output, shape index: {}]  }
   0x1   :  { %16 = vsyncpa [#allocation3 + $0x1], 0  ;;  %s2104_s30 = smov 0   ;;  %s2106_s10 = smov 0  }
   0x2   :  { %s2108_s11 = smov 0   ;;  %s2110_s12 = smov 0  }
   0x3 LB: > { %s2125_s13 = sadd.s32 4294967295, %s2046_s12   ;;  %s1674_s14 = sadd.s32 4294967294, %s2046_s12   ;;  %s2046_s12 = sphi %s2110_s12, %s2595_s12   ;;  %s2042_s11 = sphi %s2108_s11, %s2594_s11   ;;  %s2038_s10 = sphi %s2106_s10, %s2593_s10   ;;  %s2034_s30 = sphi %s2104_s30, %s2592_s30  }
   0x4   : > { %s2129_s15 = sadd.s32 1, %s2046_s12   ;;  %s233_s16 = sadd.s32 1, %s2042_s11 }
   0x5   : > { %s230_s17 = ssub.s32 %s2046_s12, %s2129_s15  ;;  %p243_p0 = scmp.ne.s32.totalorder %s2042_s11, %s2038_s10 }
   0x6   : > { %p231_p1 = scmp.eq.s32.totalorder %s230_s17, 0  ;;  %p244_p2 = scmp.eq.s32.totalorder %s2125_s13, 3 }
   0x7   : > { %p249_p3 = scmp.ne.s32.totalorder %s2038_s10, %s2034_s30  ;;  %p250_p4 = scmp.eq.s32.totalorder %s1674_s14, 3 }
   0x8   : > { %s2140_s18 = scalar_select %p231_p1, %s2042_s11, %s233_s16  }
   0x9   : > { %p2142_p5 = por %p244_p2, %p243_p0  ;;  %p2146_p6 = por %p250_p4, %p249_p3 }
   0xa   : > { %p1677_p7 = scmp.ge.s32.totalorder %s2046_s12, 1  ;;  %p310_p8 = scmp.lt.s32.totalorder %s2046_s12, 5 }
   0xc   : > { %p311_p9 = pnand %p1677_p7, %p310_p8 }
   0xd   : > { %p356_p10 = scmp.lt.s32.totalorder (!%p311_p9), %s2125_s13, 3  ;;  %s353_s28 = sand.u32 (!%p311_p9), 1, %s2038_s10  }
   0xe   : > { %314 = sbr.rel (%p311_p9) target bundleno = 1488 (0x5d0), region = 56 }
  0x13   : > { %v380_v0 = vld [vmem:[%s2583_s3 + $0x38] sm:$0xff]  ;;  %v379_v1 = vld [vmem:[%s2583_s3 + $0x30] sm:$0xff]  ;;  %v378_v2 = vld [vmem:[%s2583_s3 + $0x28] sm:$0xff]  ;;  %s2169_s16 = scalar_select %p356_p10, %s2125_s13, 3  ;;  %vm381_vm0 = vcmask 261120   ;;  %v2048_v10 = vmov 0.0   ;;  %v506_v15 = vlaneseq }
  0x14   : > { %412 = vmatprep.subr.mxu0 %v380_v0  ;;  %1848 = vmatprep.subr.mxu1 %v380_v0  ;;  %v377_v3 = vld [vmem:[%s2583_s3 + $0x20] sm:$0xff]  ;;  %v376_v4 = vld [vmem:[%s2583_s3 + $0x18] sm:$0xff]  ;;  %v375_v5 = vld [vmem:[%s2583_s3 + $0x10] sm:$0xff]  ;;  %v2049_v31 = vmov 1966171168   ;;  %vm643_vm3 = vcmask 130048  }
  0x15   : > { %413 = vmatpush1.msra.mxu0 %v379_v1  ;;  %1852 = vmatpush1.msra.mxu1 %v379_v1  ;;  %v374_v6 = vld [vmem:[%s2583_s3 + $0x8] sm:$0xff]  ;;  %s1736_s24 = sshll.u32 %s2169_s16, 4  ;;  %v373_v7 = vld [vmem:[%s2583_s3] sm:$0xff]  ;;  %v2192_v16 = vshrl.u32 %v506_v15, 7  ;;  %v552_v32 = vunpack.c.l.s4 %v2049_v31  ;;  %s1734_s14 = sshll.u32 %s2169_s16, 7 }
  0x16   : > { %414 = vmatprep.subr.mxu0 %v378_v2  ;;  %1849 = vmatprep.subr.mxu1 %v378_v2  ;;  %s370_s29 = scalar_lea.vmem %s2582_s2, %s1736_s24  ;;  %s2219_s22 = scalar_lea.vmem %s2580_s0, %s1734_s14 }
  0x17   : > { %415 = vmatpush1.msra.mxu0 %v377_v3  ;;  %1853 = vmatpush1.msra.mxu1 %v377_v3  ;;  %v371_v8 = vld [vmem:[%s370_s29] sm:$0xff]  ;;  %v372_v9 = vld [vmem:[%s370_s29 + $0x8] sm:$0xff]  ;;  %v508_v17 = vsub.s32 4, %v2192_v16  ;;  %v541_v20 = vsub.s32 7, %v2192_v16  ;;  %v519_v21 = vsub.s32 5, %v2192_v16  ;;  %v530_v24 = vsub.s32 6, %v2192_v16  ;;  %s2321_s25 = scalar_lea.vmem %s2581_s1, %s1734_s14 }
  0x18   : > { %416 = vmatprep.subr.mxu0 %v376_v4  ;;  %1850 = vmatprep.subr.mxu1 %v376_v4  ;;  %v553_v33 = vunpack.c.0.s8 %v552_v32  ;;  %v2211_v39 = vsub.s32 0, %v2192_v16  ;;  %v627_v48 = vld [vmem:[%s2219_s22] sm:$0xff]  ;;  %v628_v49 = vld [vmem:[%s2219_s22 + $0x8] sm:$0xff]  ;;  %v629_v61 = vld [vmem:[%s2219_s22 + $0x10] sm:$0xff]  ;;  %s2050_s16 = smov 64   ;;  %s1678_s29 = sshll.u32 %s353_s28, 4 }
  0x19   : > { %417 = vmatpush1.msra.mxu0 %v375_v5  ;;  %1854 = vmatpush1.msra.mxu1 %v375_v5  ;;  %v634_v62 = vld [vmem:[%s2219_s22 + $0x38] sm:$0xff]  ;;  %s1737_s14 = sshll.u32 %s2125_s13, 8  ;;  %s355_s17 = scalar_lea.vmem [#allocation2], %s1678_s29 }
  0x1a   : > { %418 = vmatprep.subr.mxu0 %v374_v6  ;;  %1851 = vmatprep.subr.mxu1 %v374_v6  ;;  %v2205_v34 = vsub.s32 %v553_v33, %v2192_v16  ;;  %s1588_s21 = sshll.u32 %s355_s17, 4  ;;  %s2534_s24 = scalar_lea.hbm %s2589_s9, %s1737_s14  ;;  %s2536_s21 = int_to_ptr.vmem [resolvable:$true] %s1588_s21 }
  0x1b   : > { %419 = vmatpush1.msra.mxu0 %v373_v7  ;;  %1855 = vmatpush1.msra.mxu1 %v373_v7  ;;  %s2540_s13 = scalar_lea.sflag [#allocation3], %s353_s28 }
  0x1c   : > { %452 = vmatprep.mubr.f32.mxu0 %v2048_v10  ;;  %458 = vmatprep.mubr.f32.mxu1 %v2048_v10  ;;  %v630_v10 = vld [vmem:[%s2219_s22 + $0x18] sm:$0xff] }
  0x1d   : > { %1685 = vmatmul.mubr.msk.f32.vlgmr.msra.gmra.mxu0 %vm381_vm0, %v371_v8  ;;  %1686 = vmatmul.mubr.msk.f32.vlgmr.msra.gmra.mxu1 %vm381_vm0, %v372_v9 }
  0xdd   : > { %v2184_v11 = vpop.f32.mrf.mxu0  ;;  %v2186_v12 = vpop.f32.mrf.mxu1 }
  0xde   : > { %1778 = vmatprep.subr.mxu1 %v2186_v12 }
  0xdf   : > { %v456_v13 = vpop.f32.mrf.mxu0  ;;  %1779 = vmatpush3.msra.mxu1 %v2186_v12  ;;  %v462_v14 = vpop.f32.mrf.mxu1 }
  0xe0   : > { %1780 = vmatprep.subr.mxu1 %v2184_v11  ;;  %465 = vxpose.xlu0.b32.start [1/2] (short) (narrow) %v456_v13, 16 }
  0xe1   : > { %1781 = vmatpush3.msra.mxu1 %v2184_v11 }
  0xe4   : > { %466 = vxpose.xlu0.b32.end [2/2] (short) (narrow) %v462_v14, 16 }
 0x15c   : > { %v481_v18 = vpop.trf.xlu0 }
 0x15d   : > { %v509_v19 = vrot.slane %v481_v18, %v508_v17  ;;  %v542_v22 = vrot.slane %v481_v18, %v541_v20  ;;  %v520_v23 = vrot.slane %v481_v18, %v519_v21  ;;  %v531_v25 = vrot.slane %v481_v18, %v530_v24 }
 0x15e   : > { %v557_v35 = vrot.slane %v481_v18, %v2205_v34 }
 0x15f   : > { %515 = vbcast.lane.b32.xlu0 %v509_v19, 264  ;;  %511 = vbcast.lane.b32.xlu1 %v509_v19, 256 }
 0x160   : > { %v2198_v26 = vpop.trf.xlu0  ;;  %v558_v36 = vcombine.high %v557_v35, %v557_v35  ;;  %v565_v38 = vrot.slane %v557_v35, %v2205_v34 }
 0x161   : > { %v1040_v27 = vrot.slane %v2198_v26, %v508_v17  ;;  %v1051_v28 = vrot.slane %v2198_v26, %v519_v21  ;;  %v1062_v29 = vrot.slane %v2198_v26, %v530_v24  ;;  %v1073_v30 = vrot.slane %v2198_v26, %v541_v20  ;;  %v631_v21 = vld [vmem:[%s2219_s22 + $0x20] sm:$0xff] }
 0x162   : > { %v572_v37 = vrot.slane %v558_v36, %v2205_v34  ;;  %v578_v41 = vrot.slane %v565_v38, %v2211_v39  ;;  %v573_v59 = vcombine.high %v565_v38, %v565_v38  ;;  %v1088_v20 = vrot.slane %v2198_v26, %v2205_v34 }
 0x163   : > { %548 = vbcast.lane.b32.xlu0 %v542_v22, 264  ;;  %522 = vbcast.lane.b32.xlu1 %v520_v23, 256 }
 0x164   : > { %v574_v40 = vcombine.high %v572_v37, %v572_v37  ;;  %v582_v46 = vrot.slane %v572_v37, %v2211_v39  ;;  %v586_v9 = vrot.slane %v573_v59, %v2211_v39  ;;  %v1089_v38 = vcombine.high %v1088_v20, %v1088_v20 }
 0x166   : > { %v590_v47 = vrot.slane %v574_v40, %v2211_v39  ;;  %v633_v40 = vld [vmem:[%s2219_s22 + $0x30] sm:$0xff] }
 0x167   : > { %526 = vbcast.lane.b32.xlu1 %v520_v23, 264 }
 0x16b   : > { %533 = vbcast.lane.b32.xlu1 %v531_v25, 256 }
 0x16f   : > { %537 = vbcast.lane.b32.xlu1 %v531_v25, 264 }
 0x173   : > { %544 = vbcast.lane.b32.xlu1 %v542_v22, 256 }
 0x177   : > { %1042 = vbcast.lane.b32.xlu1 %v1040_v27, 256 }
 0x17b   : > { %1046 = vbcast.lane.b32.xlu1 %v1040_v27, 264 }
 0x17f   : > { %1053 = vbcast.lane.b32.xlu1 %v1051_v28, 256 }
 0x183   : > { %1057 = vbcast.lane.b32.xlu1 %v1051_v28, 264 }
 0x187   : > { %1064 = vbcast.lane.b32.xlu1 %v1062_v29, 256 }
 0x18b   : > { %1068 = vbcast.lane.b32.xlu1 %v1062_v29, 264  ;;  %v1096_v29 = vrot.slane %v1088_v20, %v2205_v34 }
 0x18d   : > { %v1109_v37 = vrot.slane %v1096_v29, %v2211_v39 }
 0x18f   : > { %1075 = vbcast.lane.b32.xlu1 %v1073_v30, 256 }
 0x193   : > { %1079 = vbcast.lane.b32.xlu1 %v1073_v30, 264  ;;  %v632_v30 = vld [vmem:[%s2219_s22 + $0x28] sm:$0xff] }
 0x1d1   : > { %v512_v42 = vpop.permute.xlu1 %511  ;;  %v516_v43 = vpop.permute.xlu0 %515 }
 0x1d2   : > { %v595_v44 = vadd.f32 %v578_v41, %v512_v42  ;;  %v596_v45 = vadd.f32 %v578_v41, %v516_v43 }
 0x1d4   : > { %vm603_vm1 = vcmp.ge.f32.partialorder %v595_v44, 0.0  ;;  %v611_v50 = vmul.f32 0.2, %v595_v44  ;;  %vm604_vm2 = vcmp.ge.f32.partialorder %v596_v45, 0.0  ;;  %v612_v51 = vmul.f32 0.2, %v596_v45 }
 0x1d5   : > { %v523_v52 = vpop.permute.xlu1 %522  ;;  %v549_v53 = vpop.permute.xlu0 %548 }
 0x1d6   : > { %v597_v54 = vadd.f32 %v582_v46, %v523_v52  ;;  %v602_v55 = vadd.f32 %v590_v47, %v549_v53  ;;  %v619_v56 = vsel %vm603_vm1, %v595_v44, %v611_v50  ;;  %v620_v57 = vsel %vm604_vm2, %v596_v45, %v612_v51 }
 0x1d7   : > { %v2226_v58 = vadd.f32 %v627_v48, %v619_v56  ;;  %v2228_v60 = vadd.f32 %v628_v49, %v620_v57  ;;  %v1701_v48 = vld [vmem:[%s2219_s22 + $0x40] sm:$0xff]  ;;  %vm932_vm2 = vcmask 523264  }
 0x1d8   : > { %vm605_vm4 = vcmp.ge.f32.partialorder %v597_v54, 0.0  ;;  %v613_v63 = vmul.f32 0.2, %v597_v54  ;;  %vm610_vm5 = vcmp.ge.f32.partialorder %v602_v55, 0.0  ;;  %v618_v0 = vmul.f32 0.2, %v602_v55 }
 0x1d9   : > { %v527_v1 = vpop.permute.xlu1 %526  ;;  %v644_v2 = vsel %vm643_vm3, %v2226_v58, -inf  ;;  %v647_v14 = vsel %vm643_vm3, %v2228_v60, -inf }
 0x1da   : > { %v598_v3 = vadd.f32 %v582_v46, %v527_v1  ;;  %645 = vmax.xlane.f32.xlu0 %v644_v2  ;;  %v621_v4 = vsel %vm605_vm4, %v597_v54, %v613_v63  ;;  %v626_v5 = vsel %vm610_vm5, %v602_v55, %v618_v0  ;;  %v1702_v55 = vld [vmem:[%s2219_s22 + $0x48] sm:$0xff]  ;;  %v1104_v63 = vcombine.high %v1096_v29, %v1096_v29  ;;  %v1703_v0 = vld [vmem:[%s2219_s22 + $0x50] sm:$0xff] }
 0x1db   : > { %v2234_v6 = vadd.f32 %v629_v61, %v621_v4  ;;  %v2236_v7 = vadd.f32 %v634_v62, %v626_v5 }
 0x1dc   : > { %vm606_vm6 = vcmp.ge.f32.partialorder %v598_v3, 0.0  ;;  %v614_v8 = vmul.f32 0.2, %v598_v3 }
 0x1dd   : > { %v534_v13 = vpop.permute.xlu1 %533  ;;  %v650_v23 = vsel %vm643_vm3, %v2234_v6, -inf }
 0x1de   : > { %v599_v15 = vadd.f32 %v586_v9, %v534_v13  ;;  %648 = vmax.xlane.f32.xlu0 %v647_v14  ;;  %v622_v17 = vsel %vm606_vm6, %v598_v3, %v614_v8 }
 0x1df   : > { %v2242_v18 = vadd.f32 %v630_v10, %v622_v17  ;;  %v1704_v10 = vld [vmem:[%s2219_s22 + $0x58] sm:$0xff] }
 0x1e0   : > { %vm607_vm7 = vcmp.ge.f32.partialorder %v599_v15, 0.0  ;;  %v615_v19 = vmul.f32 0.2, %v599_v15 }
 0x1e1   : > { %v538_v22 = vpop.permute.xlu1 %537  ;;  %v653_v26 = vsel %vm643_vm3, %v2242_v18, -inf }
 0x1e2   : > { %v600_v24 = vadd.f32 %v586_v9, %v538_v22  ;;  %651 = vmax.xlane.f32.xlu0 %v650_v23  ;;  %v623_v25 = vsel %vm607_vm7, %v599_v15, %v615_v19  ;;  %v1117_v9 = vrot.slane %v1104_v63, %v2211_v39  ;;  %v1705_v23 = vld [vmem:[%s2219_s22 + $0x60] sm:$0xff] }
 0x1e3   : > { %v2249_v27 = vadd.f32 %v631_v21, %v623_v25 }
 0x1e4   : > { %vm608_vm8 = vcmp.ge.f32.partialorder %v600_v24, 0.0  ;;  %v616_v28 = vmul.f32 0.2, %v600_v24 }
 0x1e5   : > { %v545_v31 = vpop.permute.xlu1 %544  ;;  %v656_v42 = vsel %vm643_vm3, %v2249_v27, -inf }
 0x1e6   : > { %v601_v32 = vadd.f32 %v590_v47, %v545_v31  ;;  %654 = vmax.xlane.f32.xlu0 %v653_v26  ;;  %v624_v33 = vsel %vm608_vm8, %v600_v24, %v616_v28  ;;  %v1103_v47 = vrot.slane %v1089_v38, %v2205_v34  ;;  %v665_v38 = vsel %vm643_vm3, %v2236_v7, -inf }
 0x1e7   : > { %v2255_v35 = vadd.f32 %v632_v30, %v624_v33  ;;  %v1706_v33 = vld [vmem:[%s2219_s22 + $0x68] sm:$0xff] }
 0x1e8   : > { %vm609_vm9 = vcmp.ge.f32.partialorder %v601_v32, 0.0  ;;  %v617_v36 = vmul.f32 0.2, %v601_v32  ;;  %v1113_v54 = vrot.slane %v1103_v47, %v2211_v39  ;;  %v1105_v22 = vcombine.high %v1103_v47, %v1103_v47 }
 0x1e9   : > { %v1043_v41 = vpop.permute.xlu1 %1042  ;;  %v659_v15 = vsel %vm643_vm3, %v2255_v35, -inf }
 0x1ea   : > { %v1126_v43 = vadd.f32 %v1109_v37, %v1043_v41  ;;  %657 = vmax.xlane.f32.xlu0 %v656_v42  ;;  %v625_v44 = vsel %vm609_vm9, %v601_v32, %v617_v36  ;;  %v1121_v32 = vrot.slane %v1105_v22, %v2211_v39 }
 0x1eb   : > { %v2261_v45 = vadd.f32 %v633_v40, %v625_v44  ;;  %v1707_v44 = vld [vmem:[%s2219_s22 + $0x70] sm:$0xff] }
 0x1ec   : > { %vm1134_vm10 = vcmp.ge.f32.partialorder %v1126_v43, 0.0  ;;  %v1142_v46 = vmul.f32 0.2, %v1126_v43 }
 0x1ed   : > { %v1047_v49 = vpop.permute.xlu1 %1046  ;;  %v662_v28 = vsel %vm643_vm3, %v2261_v45, -inf }
 0x1ee   : > { %v1127_v50 = vadd.f32 %v1109_v37, %v1047_v49  ;;  %v1150_v51 = vsel %vm1134_vm10, %v1126_v43, %v1142_v46 }
 0x1ef   : > { %v2265_v52 = vadd.f32 %v1701_v48, %v1150_v51 }
 0x1f0   : > { %vm1135_vm11 = vcmp.ge.f32.partialorder %v1127_v50, 0.0  ;;  %v1143_v53 = vmul.f32 0.2, %v1127_v50 }
 0x1f1   : > { %v1054_v56 = vpop.permute.xlu1 %1053  ;;  %v1175_v57 = vsel %vm643_vm3, %v2265_v52, -inf }
 0x1f2   : > { %v1128_v59 = vadd.f32 %v1113_v54, %v1054_v56  ;;  %1176 = vmax.xlane.f32.xlu1 %v1175_v57  ;;  %v1151_v34 = vsel %vm1135_vm11, %v1127_v50, %v1143_v53  ;;  %v1708_v53 = vld [vmem:[%s2219_s22 + $0x78] sm:$0xff] }
 0x1f3   : > { %v2271_v61 = vadd.f32 %v1702_v55, %v1151_v34 }
 0x1f4   : > { %vm1136_vm12 = vcmp.ge.f32.partialorder %v1128_v59, 0.0  ;;  %v1144_v62 = vmul.f32 0.2, %v1128_v59 }
 0x1f5   : > { %v1058_v1 = vpop.permute.xlu1 %1057  ;;  %v1178_v2 = vsel %vm643_vm3, %v2271_v61, -inf }
 0x1f6   : > { %v1129_v3 = vadd.f32 %v1113_v54, %v1058_v1  ;;  %1179 = vmax.xlane.f32.xlu0 %v1178_v2  ;;  %v1152_v4 = vsel %vm1136_vm12, %v1128_v59, %v1144_v62 }
 0x1f7   : > { %v2276_v5 = vadd.f32 %v1703_v0, %v1152_v4 }
 0x1f8   : > { %vm1137_vm13 = vcmp.ge.f32.partialorder %v1129_v3, 0.0  ;;  %v1145_v8 = vmul.f32 0.2, %v1129_v3 }
 0x1f9   : > { %v1065_v13 = vpop.permute.xlu1 %1064  ;;  %v1181_v14 = vsel %vm643_vm3, %v2276_v5, -inf }
 0x1fa   : > { %v1130_v17 = vadd.f32 %v1117_v9, %v1065_v13  ;;  %1182 = vmax.xlane.f32.xlu1 %v1181_v14  ;;  %660 = vmax.xlane.f32.xlu0 %v659_v15  ;;  %v1153_v19 = vsel %vm1137_vm13, %v1129_v3, %v1145_v8 }
 0x1fb   : > { %v2284_v20 = vadd.f32 %v1704_v10, %v1153_v19  ;;  %v692_v10 = vld [vmem:[%s2321_s25] sm:$0xff] }
 0x1fc   : > { %vm1138_vm14 = vcmp.ge.f32.partialorder %v1130_v17, 0.0  ;;  %v1146_v21 = vmul.f32 0.2, %v1130_v17 }
 0x1fd   : > { %v1069_v24 = vpop.permute.xlu1 %1068  ;;  %v1184_v25 = vsel %vm643_vm3, %v2284_v20, -inf }
 0x1fe   : > { %v1131_v29 = vadd.f32 %v1117_v9, %v1069_v24  ;;  %1185 = vmax.xlane.f32.xlu1 %v1184_v25  ;;  %663 = vmax.xlane.f32.xlu0 %v662_v28  ;;  %v1154_v30 = vsel %vm1138_vm14, %v1130_v17, %v1146_v21  ;;  %v693_v17 = vld [vmem:[%s2321_s25 + $0x8] sm:$0xff] }
 0x1ff   : > { %v2291_v31 = vadd.f32 %v1705_v23, %v1154_v30  ;;  %v694_v23 = vld [vmem:[%s2321_s25 + $0x10] sm:$0xff] }
 0x200   : > { %vm1139_vm15 = vcmp.ge.f32.partialorder %v1131_v29, 0.0  ;;  %v1147_v26 = vmul.f32 0.2, %v1131_v29 }
 0x201   : > { %v1076_v36 = vpop.permute.xlu1 %1075  ;;  %v1187_v37 = vsel %vm643_vm3, %v2291_v31, -inf }
 0x202   : > { %v1132_v40 = vadd.f32 %v1121_v32, %v1076_v36  ;;  %1188 = vmax.xlane.f32.xlu1 %v1187_v37  ;;  %666 = vmax.xlane.f32.xlu0 %v665_v38  ;;  %v1155_v41 = vsel %vm1139_vm15, %v1131_v29, %v1147_v26  ;;  %v695_v26 = vld [vmem:[%s2321_s25 + $0x18] sm:$0xff] }
 0x203   : > { %v2299_v42 = vadd.f32 %v1706_v33, %v1155_v41  ;;  %v696_v41 = vld [vmem:[%s2321_s25 + $0x20] sm:$0xff] }
 0x204   : > { %vm1140_vm0 = vcmp.ge.f32.partialorder %v1132_v40, 0.0  ;;  %v1148_v43 = vmul.f32 0.2, %v1132_v40 }
 0x205   : > { %v1080_v46 = vpop.permute.xlu1 %1079  ;;  %v1190_v47 = vsel %vm643_vm3, %v2299_v42, -inf }
 0x206   : > { %v1133_v48 = vadd.f32 %v1121_v32, %v1080_v46  ;;  %1191 = vmax.xlane.f32.xlu1 %v1190_v47  ;;  %v1156_v49 = vsel %vm1140_vm0, %v1132_v40, %v1148_v43 }
 0x207   : > { %v2304_v50 = vadd.f32 %v1707_v44, %v1156_v49 }
 0x208   : > { %vm1141_vm1 = vcmp.ge.f32.partialorder %v1133_v48, 0.0  ;;  %v1149_v51 = vmul.f32 0.2, %v1133_v48 }
 0x209   : > { %v1193_v54 = vsel %vm643_vm3, %v2304_v50, -inf }
 0x20a   : > { %1194 = vmax.xlane.f32.xlu1 %v1193_v54  ;;  %v1157_v55 = vsel %vm1141_vm1, %v1133_v48, %v1149_v51 }
 0x20b   : > { %v2309_v56 = vadd.f32 %v1708_v53, %v1157_v55 }
 0x20d   : > { %v1196_v57 = vsel %vm643_vm3, %v2309_v56, -inf }
 0x20e   : > { %1197 = vmax.xlane.f32.xlu1 %v1196_v57 }
 0x263   : > { %v646_v59 = vpop.xlane.xlu0 %645 }
 0x264   : > { %v668_v34 = vsub.f32 %v2226_v58, %v646_v59 }
 0x266   : > { %v676_v62 = vmul.f32 1.442695, %v668_v34 }
 0x267   : > { %v649_v63 = vpop.xlane.xlu0 %648 }
 0x268   : > { %1900 = vpow2.f32 %v676_v62  ;;  %v669_v0 = vsub.f32 %v2228_v60, %v649_v63  ;;  %v1709_v62 = vld [vmem:[%s2321_s25 + $0x40] sm:$0xff] }
 0x26a   : > { %v678_v1 = vmul.f32 1.442695, %v669_v0 }
 0x26b   : > { %v652_v2 = vpop.xlane.xlu0 %651 }
 0x26c   : > { %1902 = vpow2.f32 %v678_v1  ;;  %v670_v3 = vsub.f32 %v2234_v6, %v652_v2 }
 0x26e   : > { %v680_v4 = vmul.f32 1.442695, %v670_v3 }
 0x26f   : > { %v655_v8 = vpop.xlane.xlu0 %654 }
 0x270   : > { %1904 = vpow2.f32 %v680_v4  ;;  %v671_v58 = vsub.f32 %v2242_v18, %v655_v8  ;;  %v1710_v4 = vld [vmem:[%s2321_s25 + $0x48] sm:$0xff] }
 0x272   : > { %v682_v60 = vmul.f32 1.442695, %v671_v58 }
 0x273   : > { %v658_v9 = vpop.xlane.xlu0 %657 }
 0x274   : > { %1906 = vpow2.f32 %v682_v60  ;;  %v672_v6 = vsub.f32 %v2249_v27, %v658_v9 }
 0x275   : > { %v1901_v13 = vpop.eup %1900 }
 0x276   : > { %v684_v14 = vmul.f32 1.442695, %v672_v6  ;;  %v2326_v15 = vmul.f32 %v1901_v13, %v692_v10  ;;  %v1711_v10 = vld [vmem:[%s2321_s25 + $0x50] sm:$0xff] }
 0x278   : > { %1908 = vpow2.f32 %v684_v14  ;;  %v708_v19 = vsel %vm643_vm3, %v2326_v15, 0.0 }
 0x279   : > { %v1903_v21 = vpop.eup %1902  ;;  %709 = vadd.xlane.f32.xlu0 %v708_v19 }
 0x27a   : > { %v2331_v18 = vmul.f32 %v1903_v21, %v693_v17 }
 0x27b   : > { %v1177_v22 = vpop.xlane.xlu1 %1176 }
 0x27c   : > { %v1199_v24 = vsub.f32 %v2265_v52, %v1177_v22  ;;  %v711_v27 = vsel %vm643_vm3, %v2331_v18, 0.0 }
 0x27d   : > { %v1905_v25 = vpop.eup %1904  ;;  %712 = vadd.xlane.f32.xlu0 %v711_v27 }
 0x27e   : > { %v1207_v28 = vmul.f32 1.442695, %v1199_v24  ;;  %v2337_v29 = vmul.f32 %v1905_v25, %v694_v23  ;;  %v1712_v24 = vld [vmem:[%s2321_s25 + $0x58] sm:$0xff]  ;;  %v698_v25 = vld [vmem:[%s2321_s25 + $0x30] sm:$0xff] }
 0x27f   : > { %v1180_v30 = vpop.xlane.xlu0 %1179 }
 0x280   : > { %1910 = vpow2.f32 %v1207_v28  ;;  %v1200_v32 = vsub.f32 %v2271_v61, %v1180_v30  ;;  %v714_v33 = vsel %vm643_vm3, %v2337_v29, 0.0 }
 0x281   : > { %v1907_v36 = vpop.eup %1906  ;;  %715 = vadd.xlane.f32.xlu0 %v714_v33 }
 0x282   : > { %v1209_v52 = vmul.f32 1.442695, %v1200_v32  ;;  %v2343_v37 = vmul.f32 %v1907_v36, %v695_v26 }
 0x283   : > { %v1183_v38 = vpop.xlane.xlu1 %1182  ;;  %v661_v40 = vpop.xlane.xlu0 %660 }
 0x284   : > { %1912 = vpow2.f32 %v1209_v52  ;;  %v1201_v43 = vsub.f32 %v2276_v5, %v1183_v38  ;;  %v673_v44 = vsub.f32 %v2255_v35, %v661_v40  ;;  %v717_v46 = vsel %vm643_vm3, %v2343_v37, 0.0  ;;  %v1713_v52 = vld [vmem:[%s2321_s25 + $0x60] sm:$0xff]  ;;  %v699_v38 = vld [vmem:[%s2321_s25 + $0x38] sm:$0xff] }
 0x285   : > { %v1909_v61 = vpop.eup %1908  ;;  %718 = vadd.xlane.f32.xlu0 %v717_v46 }
 0x286   : > { %v1211_v47 = vmul.f32 1.442695, %v1201_v43  ;;  %v686_v48 = vmul.f32 1.442695, %v673_v44  ;;  %v2350_v49 = vmul.f32 %v1909_v61, %v696_v41  ;;  %v1714_v61 = vld [vmem:[%s2321_s25 + $0x68] sm:$0xff] }
 0x287   : > { %v1186_v51 = vpop.xlane.xlu1 %1185  ;;  %v664_v53 = vpop.xlane.xlu0 %663 }
 0x288   : > { %1914 = vpow2.f32 %v1211_v47  ;;  %v1202_v54 = vsub.f32 %v2284_v20, %v1186_v51  ;;  %v674_v55 = vsub.f32 %v2261_v45, %v664_v53  ;;  %v720_v35 = vsel %vm643_vm3, %v2350_v49, 0.0 }
 0x289   : > { %1916 = vpow2.f32 %v686_v48  ;;  %721 = vadd.xlane.f32.xlu0 %v720_v35 }
 0x28a   : > { %v1213_v5 = vmul.f32 1.442695, %v1202_v54  ;;  %v688_v57 = vmul.f32 1.442695, %v674_v55  ;;  %v1715_v54 = vld [vmem:[%s2321_s25 + $0x70] sm:$0xff] }
 0x28b   : > { %v1189_v59 = vpop.xlane.xlu1 %1188  ;;  %v667_v34 = vpop.xlane.xlu0 %666 }
 0x28c   : > { %1918 = vpow2.f32 %v1213_v5  ;;  %v1203_v63 = vsub.f32 %v2291_v31, %v1189_v59  ;;  %v675_v0 = vsub.f32 %v2236_v7, %v667_v34 }
 0x28d   : > { %v1911_v1 = vpop.eup %1910  ;;  %1920 = vpow2.f32 %v688_v57  ;;  %v1716_v57 = vld [vmem:[%s2321_s25 + $0x78] sm:$0xff] }
 0x28e   : > { %v1215_v45 = vmul.f32 1.442695, %v1203_v63  ;;  %v690_v20 = vmul.f32 1.442695, %v675_v0  ;;  %v2359_v2 = vmul.f32 %v1911_v1, %v1709_v62 }
 0x28f   : > { %v1192_v3 = vpop.xlane.xlu1 %1191 }
 0x290   : > { %1922 = vpow2.f32 %v1215_v45  ;;  %v1204_v8 = vsub.f32 %v2299_v42, %v1192_v3  ;;  %v1240_v58 = vsel %vm643_vm3, %v2359_v2, 0.0  ;;  %v697_v42 = vld [vmem:[%s2321_s25 + $0x28] sm:$0xff]  ;;  %s1986_s25 = scalar_lea.vmem %s2536_s21, 256 }
 0x291   : > { %v1913_v60 = vpop.eup %1912  ;;  %1924 = vpow2.f32 %v690_v20  ;;  %1241 = vadd.xlane.f32.xlu1 %v1240_v58  ;;  %p1987_p11 = scmp.ne.s32.totalorder %s2536_s21, %s1986_s25 }
 0x292   : > { %v1217_v7 = vmul.f32 1.442695, %v1204_v8  ;;  %v2365_v31 = vmul.f32 %v1913_v60, %v1710_v4 }
 0x293   : > { %v1195_v9 = vpop.xlane.xlu1 %1194  ;;  %p1988_p12 = pnand %p1987_p11, %p2142_p5 }
 0x294   : > { %1926 = vpow2.f32 %v1217_v7  ;;  %v1205_v6 = vsub.f32 %v2304_v50, %v1195_v9  ;;  %v1243_v13 = vsel %vm643_vm3, %v2365_v31, 0.0 }
 0x295   : > { %v1915_v14 = vpop.eup %1914  ;;  %1244 = vadd.xlane.f32.xlu1 %v1243_v13  ;;  %p1989_p13 = pneg %p1988_p12 }
 0x296   : > { %v1917_v17 = vpop.eup %1916  ;;  %v1219_v19 = vmul.f32 1.442695, %v1205_v6  ;;  %v2372_v21 = vmul.f32 %v1915_v14, %v1711_v10 }
 0x297   : > { %v1198_v22 = vpop.xlane.xlu1 %1197  ;;  %v2374_v23 = vmul.f32 %v1917_v17, %v697_v42 }
 0x298   : > { %1928 = vpow2.f32 %v1219_v19  ;;  %v1206_v27 = vsub.f32 %v2309_v56, %v1198_v22  ;;  %v1246_v50 = vsel %vm643_vm3, %v2372_v21, 0.0 }
 0x299   : > { %v1919_v28 = vpop.eup %1918  ;;  %1247 = vadd.xlane.f32.xlu1 %v1246_v50  ;;  %v723_v30 = vsel %vm643_vm3, %v2374_v23, 0.0 }
 0x29a   : > { %v1921_v26 = vpop.eup %1920  ;;  %v1221_v32 = vmul.f32 1.442695, %v1206_v27  ;;  %724 = vadd.xlane.f32.xlu0 %v723_v30  ;;  %v2383_v33 = vmul.f32 %v1919_v28, %v1712_v24 }
 0x29b   : > { %v2385_v36 = vmul.f32 %v1921_v26, %v698_v25 }
 0x29c   : > { %1930 = vpow2.f32 %v1221_v32  ;;  %v1249_v56 = vsel %vm643_vm3, %v2383_v33, 0.0 }
 0x29d   : > { %v1923_v40 = vpop.eup %1922  ;;  %1250 = vadd.xlane.f32.xlu1 %v1249_v56  ;;  %v726_v41 = vsel %vm643_vm3, %v2385_v36, 0.0 }
 0x29e   : > { %v1925_v43 = vpop.eup %1924  ;;  %727 = vadd.xlane.f32.xlu0 %v726_v41  ;;  %v2393_v44 = vmul.f32 %v1923_v40, %v1713_v52 }
 0x29f   : > { %v2395_v46 = vmul.f32 %v1925_v43, %v699_v38 }
 0x2a0   : > { %v1252_v47 = vsel %vm643_vm3, %v2393_v44, 0.0 }
 0x2a1   : > { %v1927_v48 = vpop.eup %1926  ;;  %1253 = vadd.xlane.f32.xlu1 %v1252_v47  ;;  %v729_v51 = vsel %vm643_vm3, %v2395_v46, 0.0 }
 0x2a2   : > { %730 = vadd.xlane.f32.xlu0 %v729_v51  ;;  %v2402_v53 = vmul.f32 %v1927_v48, %v1714_v61 }
 0x2a4   : > { %v1255_v55 = vsel %vm643_vm3, %v2402_v53, 0.0 }
 0x2a5   : > { %v1929_v35 = vpop.eup %1928  ;;  %1256 = vadd.xlane.f32.xlu1 %v1255_v55 }
 0x2a6   : > { %v2407_v5 = vmul.f32 %v1929_v35, %v1715_v54 }
 0x2a8   : > { %v1258_v59 = vsel %vm643_vm3, %v2407_v5, 0.0 }
 0x2a9   : > { %v1931_v34 = vpop.eup %1930  ;;  %1259 = vadd.xlane.f32.xlu1 %v1258_v59 }
 0x2aa   : > { %v2412_v62 = vmul.f32 %v1931_v34, %v1716_v57 }
 0x2ac   : > { %v1261_v63 = vsel %vm643_vm3, %v2412_v62, 0.0 }
 0x2ad   : > { %1262 = vadd.xlane.f32.xlu1 %v1261_v63 }
 0x2b8   : > { %1292 = vrot.lane.b32.xlu0 %v2186_v12, %s2050_s16 }
 0x2be   : > { %1290 = vrot.lane.b32.xlu1 %v2184_v11, %s2050_s16  ;;  %s2051_s16 = smov [#allocation2]  }
 0x2bf   : > { %s1990_s26 = sshll.u32 %s2051_s16, 4  ;;  %s1991_s26 = int_to_ptr.vmem [resolvable:$false] %s1990_s26 }
 0x2c0   : > { %s1992_s27 = scalar_lea.vmem %s1991_s26, 512  ;;  %p1993_p0 = scmp.lt.s32.totalorder %s2536_s21, %s1991_s26 }
 0x2c1   : > { %p1994_p1 = scmp.lt.s32.totalorder %s1992_s27, %s1986_s25 }
 0x2c3   : > { %p1995_p2 = por %p1994_p1, %p1993_p0 }
 0x2c5   : > { %p1996_p3 = pnand %p1995_p2, %p1989_p13 }
 0x302   : > { %v710_v0 = vpop.xlane.xlu0 %709 }
 0x303   : > { %v732_v1 = vmax.f32 %v710_v0, 1e-20 }
 0x305   : > { %1932 = vrcp.f32 %v732_v1 }
 0x306   : > { %v713_v45 = vpop.xlane.xlu0 %712 }
 0x307   : > { %v733_v20 = vmax.f32 %v713_v45, 1e-20 }
 0x309   : > { %1934 = vrcp.f32 %v733_v20 }
 0x30a   : > { %v716_v3 = vpop.xlane.xlu0 %715 }
 0x30b   : > { %v734_v4 = vmax.f32 %v716_v3, 1e-20 }
 0x30d   : > { %1936 = vrcp.f32 %v734_v4 }
 0x30e   : > { %v719_v8 = vpop.xlane.xlu0 %718 }
 0x30f   : > { %v735_v58 = vmax.f32 %v719_v8, 1e-20 }
 0x311   : > { %1938 = vrcp.f32 %v735_v58 }
 0x312   : > { %v1933_v60 = vpop.eup %1932  ;;  %v722_v7 = vpop.xlane.xlu0 %721 }
 0x313   : > { %v736_v9 = vmax.f32 %v722_v7, 1e-20  ;;  %v748_v10 = vmul.f32 %v1933_v60, %v2326_v15  ;;  %v919_v7 = vld [vmem:[%s2586_s6 + $0x10] sm:$0xff] }
 0x315   : > { %1940 = vrcp.f32 %v736_v9  ;;  %1782 = vmatprep.mubr.msk.f32.mxu1 %vm643_vm3, %v748_v10  ;;  %v918_v9 = vld [vmem:[%s2586_s6 + $0x8] sm:$0xff]  ;;  %v917_v10 = vld [vmem:[%s2586_s6] sm:$0xff] }
 0x316   : > { %v1935_v11 = vpop.eup %1934 }
 0x317   : > { %v749_v12 = vmul.f32 %v1935_v11, %v2331_v18 }
 0x319   : > { %1783 = vmatmul.mubr.msk.f32.vlgmr.msra.gmra.mxu1 %vm643_vm3, %v749_v12 }
 0x31a   : > { %v1937_v6 = vpop.eup %1936  ;;  %v1242_v13 = vpop.xlane.xlu1 %1241 }
 0x31b   : > { %v1264_v42 = vmax.f32 %v1242_v13, 1e-20  ;;  %v750_v14 = vmul.f32 %v1937_v6, %v2337_v29 }
 0x31d   : > { %1942 = vrcp.f32 %v1264_v42  ;;  %1785 = vmatprep.mubr.msk.f32.mxu1 %vm643_vm3, %v750_v14  ;;  %v500_v42 = vld [vmem:[%s2584_s4 + $0x18] sm:$0xff] }
 0x31e   : > { %v1939_v17 = vpop.eup %1938  ;;  %v1245_v19 = vpop.xlane.xlu1 %1244 }
 0x31f   : > { %v751_v15 = vmul.f32 %v1939_v17, %v2343_v37  ;;  %v1265_v29 = vmax.f32 %v1245_v19, 1e-20  ;;  %v498_v17 = vld [vmem:[%s2584_s4 + $0x8] sm:$0xff]  ;;  %v499_v19 = vld [vmem:[%s2584_s4 + $0x10] sm:$0xff] }
 0x321   : > { %1786 = vmatmul.mubr.msk.f32.gmra.mxu1 %vm643_vm3, %v751_v15  ;;  %v502_v15 = vld [vmem:[%s2584_s4 + $0x28] sm:$0xff] }
 0x322   : > { %v1941_v22 = vpop.eup %1940  ;;  %v1248_v24 = vpop.xlane.xlu1 %1247 }
 0x323   : > { %v725_v27 = vpop.xlane.xlu0 %724  ;;  %v752_v18 = vmul.f32 %v1941_v22, %v2350_v49  ;;  %v1266_v30 = vmax.f32 %v1248_v24, 1e-20  ;;  %v497_v24 = vld [vmem:[%s2584_s4] sm:$0xff] }
 0x324   : > { %v737_v50 = vmax.f32 %v725_v27, 1e-20  ;;  %v501_v27 = vld [vmem:[%s2584_s4 + $0x20] sm:$0xff] }
 0x325   : > { %1788 = vmatprep.mubr.msk.f32.mxu1 %vm643_vm3, %v752_v18 }
 0x326   : > { %1944 = vrcp.f32 %v737_v50  ;;  %v1251_v25 = vpop.xlane.xlu1 %1250 }
 0x327   : > { %v728_v28 = vpop.xlane.xlu0 %727  ;;  %v1267_v37 = vmax.f32 %v1251_v25, 1e-20 }
 0x328   : > { %v738_v26 = vmax.f32 %v728_v28, 1e-20  ;;  %v504_v28 = vld [vmem:[%s2584_s4 + $0x38] sm:$0xff] }
 0x32a   : > { %v1943_v32 = vpop.eup %1942  ;;  %1946 = vrcp.f32 %v738_v26  ;;  %v1254_v52 = vpop.xlane.xlu1 %1253 }
 0x32b   : > { %1948 = vrcp.f32 %v1265_v29  ;;  %v731_v56 = vpop.xlane.xlu0 %730  ;;  %v1280_v38 = vmul.f32 %v1943_v32, %v2359_v2  ;;  %v1268_v40 = vmax.f32 %v1254_v52, 1e-20 }
 0x32c   : > { %1950 = vrcp.f32 %v1266_v30  ;;  %v739_v49 = vmax.f32 %v731_v56, 1e-20  ;;  %v505_v30 = vld [vmem:[%s2585_s5] sm:$0x3] }
 0x32d   : > { %1817 = vmatprep.mubr.msk.f32.mxu0 %vm643_vm3, %v1280_v38  ;;  %v503_v38 = vld [vmem:[%s2584_s4 + $0x30] sm:$0xff] }
 0x32e   : > { %1952 = vrcp.f32 %v739_v49  ;;  %v1257_v41 = vpop.xlane.xlu1 %1256 }
 0x32f   : > { %1954 = vrcp.f32 %v1267_v37  ;;  %v1269_v43 = vmax.f32 %v1257_v41, 1e-20  ;;  %v1293_v61 = vpop.permute.xlu0 %1292 }
 0x330   : > { %1956 = vrcp.f32 %v1268_v40  ;;  %1813 = vmatprep.subr.mxu0 %v1293_v61 }
 0x331   : > { %1814 = vmatpush3.msra.mxu0 %v1293_v61  ;;  %1958 = vrcp.f32 %v1269_v43  ;;  %v902_v43 = vrot.slane %v505_v30, %v2211_v39 }
 0x332   : > { %v1260_v47 = vpop.xlane.xlu1 %1259 }
 0x333   : > { %v1945_v48 = vpop.eup %1944  ;;  %v1270_v51 = vmax.f32 %v1260_v47, 1e-20 }
 0x334   : > { %v753_v54 = vmul.f32 %v1945_v48, %v2374_v23 }
 0x335   : > { %1960 = vrcp.f32 %v1270_v51 }
 0x336   : > { %1789 = vmatmul.mubr.msk.f32.gmra.mxu1 %vm643_vm3, %v753_v54  ;;  %v1263_v2 = vpop.xlane.xlu1 %1262 }
 0x337   : > { %v1947_v55 = vpop.eup %1946  ;;  %v1271_v35 = vmax.f32 %v1263_v2, 1e-20 }
 0x338   : > { %v1949_v57 = vpop.eup %1948  ;;  %v754_v59 = vmul.f32 %v1947_v55, %v2385_v36 }
 0x339   : > { %v1951_v34 = vpop.eup %1950  ;;  %1962 = vrcp.f32 %v1271_v35  ;;  %v1281_v1 = vmul.f32 %v1949_v57, %v2365_v31 }
 0x33a   : > { %1791 = vmatprep.mubr.msk.f32.mxu1 %vm643_vm3, %v754_v59  ;;  %v1291_v63 = vpop.permute.xlu1 %1290  ;;  %v1282_v20 = vmul.f32 %v1951_v34, %v2372_v21 }
 0x33b   : > { %v1953_v0 = vpop.eup %1952  ;;  %1815 = vmatprep.subr.mxu0 %v1291_v63 }
 0x33c   : > { %v1955_v45 = vpop.eup %1954  ;;  %1816 = vmatpush3.msra.mxu0 %v1291_v63  ;;  %v755_v23 = vmul.f32 %v1953_v0, %v2395_v46 }
 0x33d   : > { %v1957_v3 = vpop.eup %1956  ;;  %1818 = vmatmul.mubr.msk.f32.vlgmr.msra.gmra.mxu0 %vm643_vm3, %v1281_v1  ;;  %v1283_v36 = vmul.f32 %v1955_v45, %v2383_v33  ;;  %v924_v33 = vld [vmem:[%s2586_s6 + $0x38] sm:$0xff] }
 0x33e   : > { %1792 = vmatmul.mubr.msk.f32.gmra.mxu1 %vm643_vm3, %v755_v23  ;;  %1820 = vmatprep.mubr.msk.f32.mxu0 %vm643_vm3, %v1282_v20  ;;  %v1959_v4 = vpop.eup %1958  ;;  %v1284_v8 = vmul.f32 %v1957_v3, %v2393_v44  ;;  %v923_v44 = vld [vmem:[%s2586_s6 + $0x30] sm:$0xff]  ;;  %v1441_v20 = vsub.s32 1, %v2192_v16 }
 0x33f   : > { %v1285_v46 = vmul.f32 %v1959_v4, %v2402_v53  ;;  %1794 = vmatprep.subr.mxu1 %v924_v33  ;;  %1829 = vmatprep.subr.mxu0 %v924_v33  ;;  %v922_v53 = vld [vmem:[%s2586_s6 + $0x28] sm:$0xff] }
 0x340   : > { %1795 = vmatpush3.msra.mxu1 %v924_v33  ;;  %1830 = vmatpush3.msra.mxu0 %v924_v33 }
 0x341   : > { %1821 = vmatmul.mubr.msk.f32.gmra.mxu0 %vm643_vm3, %v1283_v36  ;;  %1796 = vmatprep.subr.mxu1 %v923_v44 }
 0x342   : > { %v1961_v31 = vpop.eup %1960  ;;  %1823 = vmatprep.mubr.msk.f32.mxu0 %vm643_vm3, %v1284_v8  ;;  %1831 = vmatprep.subr.mxu0 %v923_v44 }
 0x343   : > { %v1286_v21 = vmul.f32 %v1961_v31, %v2407_v5  ;;  %1797 = vmatpush3.msra.mxu1 %v923_v44  ;;  %1832 = vmatpush3.msra.mxu0 %v923_v44  ;;  %v921_v5 = vld [vmem:[%s2586_s6 + $0x20] sm:$0xff]  ;;  %v1442_v44 = vrot.slane %v505_v30, %v1441_v20 }
 0x344   : > { %1798 = vmatprep.subr.mxu1 %v922_v53  ;;  %1833 = vmatprep.subr.mxu0 %v922_v53 }
 0x345   : > { %1824 = vmatmul.mubr.msk.f32.gmra.mxu0 %vm643_vm3, %v1285_v46  ;;  %1799 = vmatpush3.msra.mxu1 %v922_v53 }
 0x346   : > { %v1963_v58 = vpop.eup %1962  ;;  %1826 = vmatprep.mubr.msk.f32.mxu0 %vm643_vm3, %v1286_v21  ;;  %1834 = vmatpush3.msra.mxu0 %v922_v53 }
 0x347   : > { %v1287_v60 = vmul.f32 %v1963_v58, %v2412_v62  ;;  %1800 = vmatprep.subr.mxu1 %v921_v5  ;;  %1835 = vmatprep.subr.mxu0 %v921_v5  ;;  %v920_v62 = vld [vmem:[%s2586_s6 + $0x18] sm:$0xff] }
 0x348   : > { %1801 = vmatpush3.msra.mxu1 %v921_v5  ;;  %1836 = vmatpush3.msra.mxu0 %v921_v5 }
 0x349   : > { %1827 = vmatmul.mubr.msk.f32.gmra.mxu0 %vm643_vm3, %v1287_v60  ;;  %1802 = vmatprep.subr.mxu1 %v920_v62 }
 0x34a   : > { %1837 = vmatprep.subr.mxu0 %v920_v62  ;;  %1803 = vmatpush3.msra.mxu1 %v920_v62 }
 0x34b   : > { %1838 = vmatpush3.msra.mxu0 %v920_v62  ;;  %1804 = vmatprep.subr.mxu1 %v919_v7 }
 0x34c   : > { %1839 = vmatprep.subr.mxu0 %v919_v7  ;;  %1805 = vmatpush3.msra.mxu1 %v919_v7 }
 0x34d   : > { %1840 = vmatpush3.msra.mxu0 %v919_v7  ;;  %1806 = vmatprep.subr.mxu1 %v918_v9 }
 0x34e   : > { %1841 = vmatprep.subr.mxu0 %v918_v9  ;;  %1807 = vmatpush3.msra.mxu1 %v918_v9 }
 0x34f   : > { %1842 = vmatpush3.msra.mxu0 %v918_v9  ;;  %1808 = vmatprep.subr.mxu1 %v917_v10 }
 0x350   : > { %1843 = vmatprep.subr.mxu0 %v917_v10  ;;  %1809 = vmatpush3.msra.mxu1 %v917_v10 }
 0x351   : > { %1844 = vmatpush3.msra.mxu0 %v917_v10 }
 0x3d9   : > { %v1784_v11 = vpop.f32.mrf.mxu1 }
 0x3da   : > { %v886_v50 = vmul.f32 %v1784_v11, %v498_v17 }
 0x3db   : > { %v846_v12 = vpop.f32.mrf.mxu1 }
 0x3dc   : > { %v885_v26 = vmul.f32 %v846_v12, %v497_v24 }
 0x3e1   : > { %v1787_v6 = vpop.f32.mrf.mxu1 }
 0x3e2   : > { %v888_v22 = vmul.f32 %v1787_v6, %v500_v42 }
 0x3e3   : > { %v856_v13 = vpop.f32.mrf.mxu1 }
 0x3e4   : > { %v887_v25 = vmul.f32 %v856_v13, %v499_v19  ;;  %v894_v32 = vadd.f32 %v888_v22, %v886_v50 }
 0x3e6   : > { %v893_v40 = vadd.f32 %v887_v25, %v885_v26 }
 0x3f6   : > { %v1790_v14 = vpop.f32.mrf.mxu1 }
 0x3f7   : > { %v890_v29 = vmul.f32 %v1790_v14, %v502_v15 }
 0x3f8   : > { %v866_v18 = vpop.f32.mrf.mxu1 }
 0x3f9   : > { %v889_v52 = vmul.f32 %v866_v18, %v501_v27  ;;  %v896_v49 = vadd.f32 %v894_v32, %v890_v29 }
 0x3fb   : > { %v895_v48 = vadd.f32 %v893_v40, %v889_v52 }
 0x3fd   : > { %v1819_v37 = vpop.f32.mrf.mxu0 }
 0x3fe   : > { %v1793_v56 = vpop.f32.mrf.mxu1  ;;  %v1426_v1 = vmul.f32 %v1819_v37, %v498_v17 }
 0x3ff   : > { %v892_v41 = vmul.f32 %v1793_v56, %v504_v28  ;;  %v1386_v61 = vpop.f32.mrf.mxu0 }
 0x400   : > { %v876_v47 = vpop.f32.mrf.mxu1  ;;  %v1425_v4 = vmul.f32 %v1386_v61, %v497_v24 }
 0x401   : > { %v898_v51 = vadd.f32 %v896_v49, %v892_v41  ;;  %v891_v54 = vmul.f32 %v876_v47, %v503_v38  ;;  %v1822_v2 = vpop.f32.mrf.mxu0  ;;  %v1700_v49 = vld [vmem:[%s2588_s8] ss:$0 sm:$0xff] }
 0x402   : > { %v1428_v59 = vmul.f32 %v1822_v2, %v500_v42 }
 0x403   : > { %v904_v55 = vadd.f32 %v902_v43, %v898_v51  ;;  %v897_v35 = vadd.f32 %v895_v48, %v891_v54  ;;  %v1396_v57 = vpop.f32.mrf.mxu0 }
 0x404   : > { %v1427_v45 = vmul.f32 %v1396_v57, %v499_v19  ;;  %v1434_v8 = vadd.f32 %v1428_v59, %v1426_v1 }
 0x405   : > { %v908_v34 = vmin.f32 %v904_v55, 0.0  ;;  %v903_v63 = vadd.f32 %v902_v43, %v897_v35  ;;  %v1825_v0 = vpop.f32.mrf.mxu0  ;;  %vm906_vm4 = vcmp.gt.f32.partialorder %v904_v55, 0.0 }
 0x406   : > { %v1430_v23 = vmul.f32 %v1825_v0, %v502_v15  ;;  %v1433_v58 = vadd.f32 %v1427_v45, %v1425_v4 }
 0x407   : > { %v911_v3 = vmul.f32 1.442695, %v908_v34  ;;  %v907_v39 = vmin.f32 %v903_v63, 0.0  ;;  %v1406_v36 = vpop.f32.mrf.mxu0  ;;  %vm905_vm3 = vcmp.gt.f32.partialorder %v903_v63, 0.0 }
 0x408   : > { %v1429_v31 = vmul.f32 %v1406_v36, %v501_v27  ;;  %v1436_v60 = vadd.f32 %v1434_v8, %v1430_v23 }
 0x409   : > { %1964 = vpow2.f32 %v911_v3  ;;  %v909_v46 = vmul.f32 1.442695, %v907_v39  ;;  %v1828_v21 = vpop.f32.mrf.mxu0 }
 0x40a   : > { %v1432_v33 = vmul.f32 %v1828_v21, %v504_v28  ;;  %v1435_v5 = vadd.f32 %v1433_v58, %v1429_v31  ;;  %v1697_v28 = vld [vmem:[%s2587_s7] ss:$0 sm:$0xff] }
 0x40b   : > { %1966 = vpow2.f32 %v909_v46  ;;  %v1416_v53 = vpop.f32.mrf.mxu0 }
 0x40c   : > { %v1438_v62 = vadd.f32 %v1436_v60, %v1432_v33  ;;  %v1431_v7 = vmul.f32 %v1416_v53, %v503_v38 }
 0x40e   : > { %v1444_v9 = vadd.f32 %v1442_v44, %v1438_v62  ;;  %v1437_v16 = vadd.f32 %v1435_v5, %v1431_v7 }
 0x410   : > { %v1448_v10 = vmin.f32 %v1444_v9, 0.0  ;;  %v1443_v11 = vadd.f32 %v1442_v44, %v1437_v16  ;;  %vm1446_vm6 = vcmp.gt.f32.partialorder %v1444_v9, 0.0 }
 0x412   : > { %v1451_v12 = vmul.f32 1.442695, %v1448_v10  ;;  %v1447_v6 = vmin.f32 %v1443_v11, 0.0  ;;  %vm1445_vm5 = vcmp.gt.f32.partialorder %v1443_v11, 0.0 }
 0x414   : > { %1968 = vpow2.f32 %v1451_v12  ;;  %v1449_v13 = vmul.f32 1.442695, %v1447_v6 }
 0x416   : > { %v1965_v42 = vpop.eup %1964  ;;  %1970 = vpow2.f32 %v1449_v13 }
 0x417   : > { %v1696_v17 = vadd.f32 -1.0, %v1965_v42 }
 0x418   : > { %v1967_v14 = vpop.eup %1966 }
 0x419   : > { %v1695_v19 = vadd.f32 -1.0, %v1967_v14  ;;  %v2507_v22 = vsel %vm906_vm4, %v904_v55, %v1696_v17 }
 0x41b   : > { %v2503_v15 = vsel %vm905_vm3, %v903_v63, %v1695_v19 }
 0x41c   : > { %1810 = vmatprep.mubr.msk.f32.mxu1 %vm932_vm2, %v2503_v15 }
 0x41d   : > { %1811 = vmatmul.mubr.msk.f32.vlgmr.msra.gmra.mxu1 %vm932_vm2, %v2507_v22 }
 0x421   : > { %v1969_v24 = vpop.eup %1968 }
 0x422   : > { %v1726_v18 = vadd.f32 -1.0, %v1969_v24 }
 0x423   : > { %v1971_v27 = vpop.eup %1970 }
 0x424   : > { %v1725_v50 = vadd.f32 -1.0, %v1971_v27  ;;  %v2515_v29 = vsel %vm1446_vm6, %v1444_v9, %v1726_v18 }
 0x426   : > { %v2511_v25 = vsel %vm1445_vm5, %v1443_v11, %v1725_v50 }
 0x427   : > { %1845 = vmatprep.mubr.msk.f32.mxu0 %vm932_vm2, %v2511_v25 }
 0x428   : > { %1846 = vmatmul.mubr.msk.f32.vlgmr.msra.gmra.mxu0 %vm932_vm2, %v2515_v29 }
 0x4dd   : > { %v1812_v30 = vpop.f32.mrf.mxu1 }
 0x4de   : > { %v1011_v26 = vadd.f32 %v1812_v30, %v1697_v28 }
 0x4df   : > { %v1005_v32 = vpop.f32.mrf.mxu1 }
 0x4e0   : > { %1972 = vtanh.f32 %v1011_v26  ;;  %v1006_v52 = vadd.f32 %v1697_v28, %v1005_v32 }
 0x4e2   : > { %1974 = vtanh.f32 %v1006_v52 }
 0x4e8   : > { %v1847_v37 = vpop.f32.mrf.mxu0 }
 0x4e9   : > { %v1535_v56 = vadd.f32 %v1847_v37, %v1697_v28 }
 0x4ea   : > { %v1529_v38 = vpop.f32.mrf.mxu0 }
 0x4eb   : > { %1976 = vtanh.f32 %v1535_v56  ;;  %v1530_v40 = vadd.f32 %v1697_v28, %v1529_v38 }
 0x4ed   : > { %v1973_v41 = vpop.eup %1972  ;;  %1978 = vtanh.f32 %v1530_v40 }
 0x4ee   : > { %v1024_v43 = vmul.f32 %v1973_v41, %v1700_v49 }
 0x4ef   : > { %v1975_v61 = vpop.eup %1974 }
 0x4f0   : > { %1027 = vadd.xlane.f32.xlu0 %v1024_v43  ;;  %v1023_v47 = vmul.f32 %v1975_v61, %v1700_v49 }
 0x4f2   : > { %1025 = vadd.xlane.f32.xlu1 %v1023_v47 }
 0x4f8   : > { %v1977_v48 = vpop.eup %1976 }
 0x4f9   : > { %v1541_v51 = vmul.f32 %v1977_v48, %v1700_v49 }
 0x4fa   : > { %v1979_v54 = vpop.eup %1978 }
 0x4fb   : > { %1544 = vadd.xlane.f32.xlu1 %v1541_v51  ;;  %v1540_v2 = vmul.f32 %v1979_v54, %v1700_v49 }
 0x4fd   : > { %1542 = vadd.xlane.f32.xlu0 %v1540_v2 }
 0x579   : > { %v1028_v55 = vpop.xlane.xlu0 %1027 }
 0x57b   : > { %v1026_v35 = vpop.xlane.xlu1 %1025 }
 0x57c   : > { %v1029_v57 = vadd.f32 %v1028_v55, %v1026_v35 }
 0x57e   : > { %v1030_v59 = vrot.slane %v1029_v57, 4 }
 0x580   : > { %v1031_v34 = vadd.f32 %v1030_v59, %v1029_v57 }
 0x582   : > { %v1032_v63 = vrot.slane %v1031_v34, 2 }
 0x584   : > { %v1545_v0 = vpop.xlane.xlu1 %1544  ;;  %v1033_v23 = vadd.f32 %v1032_v63, %v1031_v34 }
 0x586   : > { %v1543_v1 = vpop.xlane.xlu0 %1542  ;;  %v1034_v39 = vrot.slane %v1033_v23, 1 }
 0x587   : > { %v1546_v45 = vadd.f32 %v1545_v0, %v1543_v1 }
 0x588   : > { %v1035_v8 = vadd.f32 %v1034_v39, %v1033_v23 }
 0x589   : > { %v1547_v20 = vrot.slane %v1546_v45, 4 }
 0x58a   : > { %v1036_v21 = vmul.f32 0.0625, %v1035_v8 }
 0x58b   : > { %v1548_v3 = vadd.f32 %v1547_v20, %v1546_v45 }
 0x58d   : > { %v1549_v36 = vrot.slane %v1548_v3, 2 }
 0x58f   : > { %v1550_v4 = vadd.f32 %v1549_v36, %v1548_v3 }
 0x591   : > { %v1551_v31 = vrot.slane %v1550_v4, 1 }
 0x593   : > { %v1552_v46 = vadd.f32 %v1551_v31, %v1550_v4 }
 0x595   : > { %v1553_v58 = vmul.f32 0.0625, %v1552_v46 }
 0x597   : > { %v1554_v60 = vmax.f32 %v1036_v21, %v1553_v58 }
 0x599   : > { %v1555_v33 = vsub.f32 %v1036_v21, %v1554_v60  ;;  %v1558_v44 = vsub.f32 %v1553_v58, %v1554_v60 }
 0x59b   : > { %v1556_v53 = vmul.f32 1.442695, %v1555_v33  ;;  %v1559_v5 = vmul.f32 1.442695, %v1558_v44 }
 0x59d   : > { %1980 = vpow2.f32 %v1556_v53 }
 0x59e   : > { %1982 = vpow2.f32 %v1559_v5 }
 0x5aa   : > { %v1981_v62 = vpop.eup %1980 }
 0x5ab   : > { %v1983_v7 = vpop.eup %1982 }
 0x5ac   : > { %v1561_v9 = vadd.f32 %v1983_v7, %v1981_v62 }
 0x5ae   : > { %1984 = vrcp.f32 %v1561_v9 }
 0x5bb   : > { %v1985_v16 = vpop.eup %1984 }
 0x5bc   : > { %v1564_v10 = vmul.f32 %v1985_v16, %v1981_v62  ;;  %v1567_v11 = vmul.f32 %v1985_v16, %v1983_v7 }
 0x5be   : > { %v1565_v12 = vmul.f32 %v1564_v10, %v2503_v15  ;;  %v1566_v6 = vmul.f32 %v1564_v10, %v2507_v22  ;;  %v1568_v13 = vmul.f32 %v1567_v11, %v2511_v25  ;;  %v1569_v42 = vmul.f32 %v1567_v11, %v2515_v29 }
 0x5c0   : > { %v1570_v14 = vadd.f32 %v1568_v13, %v1565_v12  ;;  %v1571_v17 = vadd.f32 %v1569_v42, %v1566_v6 }
 0x5c2   : > { %1572 = vst.msk [vmem:[%s355_s17] sm:$0xff] %vm932_vm2, %v1570_v14  ;;  %1573 = vst.msk [vmem:[%s355_s17 + $0x8] sm:$0xff] %vm932_vm2, %v1571_v17 }
 0x5c3   : > { %1999 = shalt.err (!%p1996_p3)
}
 0x5c4   : > { %s2000_s28 = scalar_lea.hbm %s2534_s24, 256  ;;  %s2004_s17 = scalar_lea.hbm %s2589_s9, 1024 }
 0x5c5   : > { %p2001_p4 = scmp.ne.s32.totalorder %s2534_s24, %s2000_s28  ;;  %p2005_p9 = scmp.lt.s32.totalorder %s2534_s24, %s2589_s9 }
 0x5c6   : > { %p2006_p10 = scmp.lt.s32.totalorder %s2004_s17, %s2000_s28 }
 0x5c7   : > { %p2002_p7 = pnand %p2001_p4, %p2142_p5 }
 0x5c8   : > { %p2007_p11 = por %p2006_p10, %p2005_p9 }
 0x5c9   : > { %p2003_p8 = pneg %p2002_p7 }
 0x5cb   : > { %p2008_p12 = pnand %p2007_p11, %p2003_p8 }
 0x5cd   : > { %2011 = shalt.err (!%p2008_p12)
}
 0x5ce   : > { %s2052_s25 = smov 128   ;;  %s2053_s16 = smov 8  }
 0x5cf   : > { %1856 = dma.vmem_to_hbm [thread:$0]  (%p2142_p5), %s2536_s21, 256, %s2534_s24, %s2540_s13, %s2052_s25, %s2052_s25, %s2053_s16  }
 0x5d0 PF: > { %p1862_p13 = scmp.ge.s32.totalorder %s2046_s12, 2  ;;  %s1603_s26 = sand.u32 1, %s2034_s30  }
 0x5d1   : > { %s1604_s27 = scalar_lea.sflag [#allocation3], %s1603_s26 }
 0x5d2   : > { %p1859_p0 = pnand %p1862_p13, %p2146_p6 }
 0x5d4   : > { %p1860_p1 = pneg %p1859_p0 }
 0x5d6   : > { %2029 = dma.done.wait (%p1860_p1), %s1604_s27, 256  }
 0x5d7   : > { %2031 = vsyncadd (%p1860_p1), %s1604_s27, 4294967040  ;;  %p19_p2 = scmp.ge.s32.totalorder %s2129_s15, 6   ;;  %s2592_s30 = smov %s2038_s10 }
 0x5d8   : > { %s2593_s10 = smov %s2042_s11  ;;  %s2594_s11 = smov %s2140_s18 }
 0x5d9   : > { %s2595_s12 = smov %s2129_s15  ;;  %21 = sbr.rel (!%p19_p2) target bundleno = 3 (0x3), region = 99 }
 0x5de   :  { %1609 = vsyncpa [#allocation3], 1 }
 0x5df   :  { %1611 = vsyncpa [#allocation3 + $0x1], 1 }

</bundles_post_ra>
